<compile_context>
chip_gen: v7x
topology: tpu7x:2x2x1
jax: 0.10.0
libtpu: 0.0.40
codegen_flags: <defaults>
</compile_context>

<pallas_src>
import jax
import jax.numpy as jnp
from jax.experimental import pallas as pl
from jax.experimental.pallas import tpu as pltpu


def _attention_kernel(b_ref, x_ref, qg_ref, w_ref, out_ref, m_sc, l_sc, acc_sc):
    ni = pl.program_id(1)                     # N-tile index (reduction axis)
    tb = out_ref.shape[0]                     # segment tile
    tn = x_ref.shape[0]                       # node tile
    d2p = w_ref.shape[0]                      # padded dim_2

    @pl.when(ni == 0)
    def _init():
        m_sc[...] = jnp.full_like(m_sc, -1e30)
        l_sc[...] = jnp.zeros_like(l_sc)
        acc_sc[...] = jnp.zeros_like(acc_sc)

    x = x_ref[...]                                                   # [tn, D1]

    # One fused, lane-dense MXU matmul: [2*D2p, D1] x [tn, D1]^T -> [2*D2p, tn]
    # (N lives on the 128-lane axis; f32 accumulation).
    qg = jax.lax.dot_general(qg_ref[...], x,
                             dimension_numbers=(((1,), (1,)), ((), ())),
                             preferred_element_type=jnp.float32)     # [2*D2p, tn]
    que = jnp.tanh(qg[:d2p, :])                                      # [D2p, tn]
    gate = jax.nn.sigmoid(qg[d2p:, :])                               # [D2p, tn]
    # key[n] = sum_d w[d] * que[d, n] * gate[d, n]  -- sublane reduce, no
    # transpose needed; padded D2 rows contribute 0 because w is zero-padded.
    key_row = jnp.sum(que * gate * w_ref[...], axis=0, keepdims=True)  # [1, tn]

    # On-chip segment mask for this (B-tile, N-tile); no [B, N] matrix in HBM.
    seg_ids = (jax.lax.broadcasted_iota(jnp.int32, (tb, tn), 0)
               + pl.program_id(0) * tb)
    mask = seg_ids == b_ref[...]                                       # [tb,tn]

    # Online segment softmax (flash-style) in [B, N_tile] layout.
    masked_keys = jnp.where(mask, key_row, -1e30)                      # [tb,tn]
    m_prev = m_sc[...]
    m_new = jnp.maximum(m_prev, jnp.max(masked_keys, axis=-1, keepdims=True))
    alpha = jnp.exp(m_prev - m_new)                                    # [tb,1]
    p = jnp.where(mask, jnp.exp(key_row - m_new), 0.0)                 # [tb,tn]
    l_sc[...] = alpha * l_sc[...] + jnp.sum(p, axis=-1, keepdims=True)
    acc_sc[...] = alpha * acc_sc[...] + jnp.dot(
        p.astype(x.dtype), x, preferred_element_type=jnp.float32)      # [tb,D1]
    m_sc[...] = m_new

    @pl.when(ni == pl.num_programs(1) - 1)
    def _finalize():
        # Exact divide (once per B tile) for torch parity.
        out_ref[...] = (acc_sc[...] / (l_sc[...] + 1e-16)).astype(out_ref.dtype)


def attention_module_forward(x, batch, que_transform, gate_transform, weight,
                             num_segments, *, block_n=2048, block_b=None,
                             compute_dtype=jnp.bfloat16, buffering=None):
    """x: [N, dim_1]; batch: [N] int segment ids in [0, num_segments);
    que/gate_transform: [dim_2, dim_1]; weight: [dim_2, 1].
    Returns [num_segments, dim_1] float32.
    """
    n, d1 = x.shape
    d2 = que_transform.shape[0]
    b = int(num_segments)

    # N tile: multiple of 128 (lane-dense), clamped to the padded N.
    n128 = ((n + 127) // 128) * 128
    tn = min(max(128, (int(block_n) // 128) * 128), n128)
    np_ = ((n + tn - 1) // tn) * tn

    # B tile: multiple of 8.  When unspecified, cap so the f32 accumulator plus
    # a double-buffered output block (~3*tb*d1*4 B) stays <= ~6 MiB -- safe for
    # v5e's 16 MiB scoped-VMEM default and v7x's 64 MiB physical VMEM while
    # leaving room for the streamed x / batch-id tile buffers.
    if block_b is None:
        vmem_budget = 6 * 1024 * 1024
        tb_cap = max(8, (vmem_budget // (3 * d1 * 4)) // 8 * 8)
        tb = min(((b + 7) // 8) * 8, tb_cap)
    else:
        tb = max(8, (int(block_b) // 8) * 8)
    bp = ((b + tb - 1) // tb) * tb

    # Pad nodes; padded rows get segment id `bp`, which matches no segment.
    xp = jnp.pad(x.astype(compute_dtype), ((0, np_ - n), (0, 0)))
    bid = jnp.pad(batch.astype(jnp.int32), (0, np_ - n),
                  constant_values=bp).reshape(1, np_)

    # Stack Q and G (rows padded to a multiple of 8 sublanes) -> one operand,
    # one MXU push per x tile.  Padded rows are harmless: w is zero-padded.
    d2p = ((d2 + 7) // 8) * 8
    qg = jnp.zeros((2 * d2p, d1), compute_dtype)
    qg = qg.at[:d2].set(que_transform.astype(compute_dtype))
    qg = qg.at[d2p:d2p + d2].set(gate_transform.astype(compute_dtype))
    w_col = jnp.zeros((d2p, 1), jnp.float32).at[:d2].set(
        weight.astype(jnp.float32))

    bid_spec = pl.BlockSpec((1, tn), lambda bi, ni: (0, ni))
    x_spec = pl.BlockSpec((tn, d1), lambda bi, ni: (ni, 0))
    if buffering is not None and int(buffering) != 2:
        bid_spec = pl.BlockSpec((1, tn), lambda bi, ni: (0, ni),
                                pipeline_mode=pl.Buffered(int(buffering)))
        x_spec = pl.BlockSpec((tn, d1), lambda bi, ni: (ni, 0),
                              pipeline_mode=pl.Buffered(int(buffering)))

    grid = (bp // tb, np_ // tn)
    out = pl.pallas_call(
        _attention_kernel,
        out_shape=jax.ShapeDtypeStruct((bp, d1), jnp.float32),
        grid_spec=pltpu.PrefetchScalarGridSpec(
            num_scalar_prefetch=0,
            grid=grid,
            in_specs=[
                bid_spec,                                          # batch ids
                x_spec,                                            # x tile
                pl.BlockSpec((2 * d2p, d1), lambda bi, ni: (0, 0)),  # [Q;G]
                pl.BlockSpec((d2p, 1), lambda bi, ni: (0, 0)),       # w column
            ],
            out_specs=pl.BlockSpec((tb, d1), lambda bi, ni: (bi, 0)),
            scratch_shapes=[
                pltpu.VMEM((tb, 1), jnp.float32),     # running segment max
                pltpu.VMEM((tb, 1), jnp.float32),     # running segment sum
                pltpu.VMEM((tb, d1), jnp.float32),    # output accumulator
            ]),
        compiler_params=pltpu.CompilerParams(
            dimension_semantics=("parallel", "arbitrary")),
    )(bid, xp, qg, w_col)
    return out[:b]


def _reference(x, batch, Q, G, w, num_segments):
    que = jnp.tanh(Q @ x.T)
    gated = jax.nn.sigmoid(G @ x.T)
    key = (w.T @ (que * gated)).T                          # [N, 1]
    seg_max = jax.ops.segment_max(key[:, 0], batch, num_segments)
    ex = jnp.exp(key[:, 0] - seg_max[batch])
    seg_sum = jax.ops.segment_sum(ex, batch, num_segments)
    attn = (ex / (seg_sum[batch] + 1e-16))[:, None]
    return jax.ops.segment_sum(x * attn, batch, num_segments)


if __name__ == "__main__":
    key0 = jax.random.PRNGKey(0)
    k1, k2, k3, k4, k5 = jax.random.split(key0, 5)

    N, DIM_1, DIM_2, B = 1000, 32, 16, 6

    # Deterministic kaiming-normal-style init (std = sqrt(2 / fan_in)).
    que_transform = jax.random.normal(k1, (DIM_2, DIM_1), jnp.float32) * jnp.sqrt(2.0 / DIM_1)
    gate_transform = jax.random.normal(k2, (DIM_2, DIM_1), jnp.float32) * jnp.sqrt(2.0 / DIM_1)
    weight = jax.random.normal(k3, (DIM_2, 1), jnp.float32) * jnp.sqrt(2.0)

    x = jax.random.normal(k4, (N, DIM_1), jnp.float32)
    batch = jax.random.randint(k5, (N,), 0, B).astype(jnp.int32)   # unsorted is fine

    ref = _reference(x, batch, que_transform, gate_transform, weight, B)

    # f32-streamed instance: torch-parity numerics.
    out = attention_module_forward(x, batch, que_transform, gate_transform,
                                   weight, B, compute_dtype=jnp.float32)
    out = jax.block_until_ready(out)
    assert out.shape == (B, DIM_1)
    assert jnp.allclose(out, ref, atol=2e-3, rtol=2e-3), \
        float(jnp.max(jnp.abs(out - ref)))

    # Default (bf16-streamed x / p@x) instance: the mem-bound fast path.
    out_bf16 = attention_module_forward(x, batch, que_transform, gate_transform,
                                        weight, B)
    out_bf16 = jax.block_until_ready(out_bf16)
    assert out_bf16.shape == (B, DIM_1)
    assert jnp.allclose(out_bf16, ref, atol=3e-2, rtol=3e-2), \
        float(jnp.max(jnp.abs(out_bf16 - ref)))

    print("KERNEL_OK")
</pallas_src>

<mosaic_0001>
module attributes {stable_mosaic.version = 11 : i64} {
  func.func @_attention_kernel(%arg0: i32, %arg1: i32, %arg2: memref<1x1024xi32, #tpu.memory_space<vmem>>, %arg3: memref<1024x32xf32, #tpu.memory_space<vmem>>, %arg4: memref<32x32xf32, #tpu.memory_space<vmem>>, %arg5: memref<16x1xf32, #tpu.memory_space<vmem>>, %arg6: memref<8x32xf32, #tpu.memory_space<vmem>>, %arg7: memref<8x1xf32, #tpu.memory_space<vmem>>, %arg8: memref<8x1xf32, #tpu.memory_space<vmem>>, %arg9: memref<8x32xf32, #tpu.memory_space<vmem>>) attributes {dimension_semantics = [#tpu.dimension_semantics<parallel>, #tpu.dimension_semantics<arbitrary>], iteration_bounds = array<i64: 1, 1>, scalar_prefetch = 0 : i64, scratch_operands = 3 : i64, tpu.core_type = #tpu.core_type<tc>, window_params = [{transform_indices = @transform_0, window_bounds = array<i64: 1, 1024>}, {transform_indices = @transform_1, window_bounds = array<i64: 1024, 32>}, {pipeline_mode = #tpu.pipeline_mode<synchronous>, transform_indices = @transform_2, window_bounds = array<i64: 32, 32>}, {pipeline_mode = #tpu.pipeline_mode<synchronous>, transform_indices = @transform_3, window_bounds = array<i64: 16, 1>}, {transform_indices = @transform_4, window_bounds = array<i64: 8, 32>}]} {
    %c0_i32 = arith.constant 0 : i32
    %0 = arith.cmpi eq, %arg1, %c0_i32 : i32
    %1 = arith.extui %0 : i1 to i32
    %c0_i32_0 = arith.constant 0 : i32
    %2 = arith.cmpi ne, %1, %c0_i32_0 : i32
    scf.if %2 {
      %cst_29 = arith.constant -1.000000e+30 : f32
      %59 = vector.broadcast %cst_29 : f32 to vector<8x1xf32>
      %c0_30 = arith.constant 0 : index
      %c0_31 = arith.constant 0 : index
      %60 = vector.load %arg7[%c0_30, %c0_31] : memref<8x1xf32, #tpu.memory_space<vmem>>, vector<8x1xf32>
      tpu.vector_store %arg7[%c0_30, %c0_31], %59 {strides = array<i32>} : memref<8x1xf32, #tpu.memory_space<vmem>>, vector<8x1xf32>,
      %cst_32 = arith.constant 0.000000e+00 : f32
      %61 = vector.broadcast %cst_32 : f32 to vector<8x1xf32>
      %c0_33 = arith.constant 0 : index
      %c0_34 = arith.constant 0 : index
      %62 = vector.load %arg8[%c0_33, %c0_34] : memref<8x1xf32, #tpu.memory_space<vmem>>, vector<8x1xf32>
      tpu.vector_store %arg8[%c0_33, %c0_34], %61 {strides = array<i32>} : memref<8x1xf32, #tpu.memory_space<vmem>>, vector<8x1xf32>,
      %cst_35 = arith.constant 0.000000e+00 : f32
      %63 = vector.broadcast %cst_35 : f32 to vector<8x32xf32>
      %c0_36 = arith.constant 0 : index
      %c0_37 = arith.constant 0 : index
      %64 = vector.load %arg9[%c0_36, %c0_37] : memref<8x32xf32, #tpu.memory_space<vmem>>, vector<8x32xf32>
      tpu.vector_store %arg9[%c0_36, %c0_37], %63 {strides = array<i32>} : memref<8x32xf32, #tpu.memory_space<vmem>>, vector<8x32xf32>,
    } else {
    }
    %c0 = arith.constant 0 : index
    %c0_1 = arith.constant 0 : index
    %3 = vector.load %arg3[%c0, %c0_1] : memref<1024x32xf32, #tpu.memory_space<vmem>>, vector<1024x32xf32>
    %c0_2 = arith.constant 0 : index
    %c0_3 = arith.constant 0 : index
    %4 = vector.load %arg4[%c0_2, %c0_3] : memref<32x32xf32, #tpu.memory_space<vmem>>, vector<32x32xf32>
    %cst = arith.constant dense<0.000000e+00> : vector<32x1024xf32>
    %5 = tpu.matmul %4, %3, %cst {dimension_numbers = #tpu.dot_dimension_numbers<[1], [1], [0], [0], [0, 0, 1, 0], [], []>} : vector<32x32xf32>, vector<1024x32xf32>, vector<32x1024xf32> -> vector<32x1024xf32>
    %6 = vector.extract_strided_slice %5 {offsets = [0, 0], sizes = [16, 1024], strides = [1, 1]} : vector<32x1024xf32> to vector<16x1024xf32>
    %7 = math.tanh %6 : vector<16x1024xf32>
    %8 = vector.extract_strided_slice %5 {offsets = [16, 0], sizes = [16, 1024], strides = [1, 1]} : vector<32x1024xf32> to vector<16x1024xf32>
    %9 = arith.negf %8 : vector<16x1024xf32>
    %10 = math.exp %9 : vector<16x1024xf32>
    %cst_4 = arith.constant 1.000000e+00 : f32
    %11 = vector.broadcast %cst_4 : f32 to vector<16x1024xf32>
    %12 = arith.addf %11, %10 : vector<16x1024xf32>
    %13 = arith.divf %11, %12 : vector<16x1024xf32>
    %14 = arith.mulf %7, %13 : vector<16x1024xf32>
    %c0_5 = arith.constant 0 : index
    %c0_6 = arith.constant 0 : index
    %15 = vector.load %arg5[%c0_5, %c0_6] : memref<16x1xf32, #tpu.memory_space<vmem>>, vector<16x1xf32>
    %16 = vector.broadcast %15 : vector<16x1xf32> to vector<16x1024xf32>
    %17 = arith.mulf %14, %16 : vector<16x1024xf32>
    %cst_7 = arith.constant dense<0.000000e+00> : vector<1024xf32>
    %18 = vector.multi_reduction <add>, %17, %cst_7 [0] : vector<16x1024xf32> to vector<1024xf32>
    %19 = vector.shape_cast %18 : vector<1024xf32> to vector<1x1024xf32>
    %20 = tpu.iota {dimensions = array<i32: 0>} : vector<8x1024xi32>
    %c8_i32 = arith.constant 8 : i32
    %21 = arith.muli %arg0, %c8_i32 : i32
    %22 = vector.broadcast %21 : i32 to vector<8x1024xi32>
    %23 = arith.addi %20, %22 : vector<8x1024xi32>
    %c0_8 = arith.constant 0 : index
    %c0_9 = arith.constant 0 : index
    %24 = vector.load %arg2[%c0_8, %c0_9] : memref<1x1024xi32, #tpu.memory_space<vmem>>, vector<1x1024xi32>
    %25 = vector.broadcast %24 : vector<1x1024xi32> to vector<8x1024xi32>
    %26 = arith.cmpi eq, %23, %25 : vector<8x1024xi32>
    %cst_10 = arith.constant -1.000000e+30 : f32
    %27 = vector.shape_cast %19 : vector<1x1024xf32> to vector<1x1024xf32>
    %28 = vector.broadcast %27 : vector<1x1024xf32> to vector<8x1024xf32>
    %29 = vector.broadcast %cst_10 : f32 to vector<8x1024xf32>
    %30 = arith.select %26, %28, %29 : vector<8x1024xi1>, vector<8x1024xf32>
    %c0_11 = arith.constant 0 : index
    %c0_12 = arith.constant 0 : index
    %31 = vector.load %arg7[%c0_11, %c0_12] : memref<8x1xf32, #tpu.memory_space<vmem>>, vector<8x1xf32>
    %cst_13 = arith.constant dense<0xFF800000> : vector<8xf32>
    %32 = vector.multi_reduction <maximumf>, %30, %cst_13 [1] : vector<8x1024xf32> to vector<8xf32>
    %33 = vector.shape_cast %32 : vector<8xf32> to vector<8x1xf32>
    %34 = arith.maximumf %31, %33 : vector<8x1xf32>
    %35 = arith.subf %31, %34 : vector<8x1xf32>
    %36 = math.exp %35 : vector<8x1xf32>
    %37 = vector.broadcast %19 : vector<1x1024xf32> to vector<8x1024xf32>
    %38 = vector.broadcast %34 : vector<8x1xf32> to vector<8x1024xf32>
    %39 = arith.subf %37, %38 : vector<8x1024xf32>
    %40 = math.exp %39 : vector<8x1024xf32>
    %cst_14 = arith.constant 0.000000e+00 : f32
    %41 = vector.broadcast %cst_14 : f32 to vector<8x1024xf32>
    %42 = arith.select %26, %40, %41 : vector<8x1024xi1>, vector<8x1024xf32>
    %c0_15 = arith.constant 0 : index
    %c0_16 = arith.constant 0 : index
    %43 = vector.load %arg8[%c0_15, %c0_16] : memref<8x1xf32, #tpu.memory_space<vmem>>, vector<8x1xf32>
    %44 = arith.mulf %36, %43 : vector<8x1xf32>
    %cst_17 = arith.constant dense<0.000000e+00> : vector<8xf32>
    %45 = vector.multi_reduction <add>, %42, %cst_17 [1] : vector<8x1024xf32> to vector<8xf32>
    %46 = vector.shape_cast %45 : vector<8xf32> to vector<8x1xf32>
    %47 = arith.addf %44, %46 : vector<8x1xf32>
    %c0_18 = arith.constant 0 : index
    %c0_19 = arith.constant 0 : index
    %48 = vector.load %arg8[%c0_18, %c0_19] : memref<8x1xf32, #tpu.memory_space<vmem>>, vector<8x1xf32>
    tpu.vector_store %arg8[%c0_18, %c0_19], %47 {strides = array<i32>} : memref<8x1xf32, #tpu.memory_space<vmem>>, vector<8x1xf32>,
    %c0_20 = arith.constant 0 : index
    %c0_21 = arith.constant 0 : index
    %49 = vector.load %arg9[%c0_20, %c0_21] : memref<8x32xf32, #tpu.memory_space<vmem>>, vector<8x32xf32>
    %50 = vector.broadcast %36 : vector<8x1xf32> to vector<8x32xf32>
    %51 = arith.mulf %50, %49 : vector<8x32xf32>
    %cst_22 = arith.constant dense<0.000000e+00> : vector<8x32xf32>
    %52 = tpu.matmul %42, %3, %cst_22 {dimension_numbers = #tpu.dot_dimension_numbers<[1], [0], [0], [1], [0, 0, 1, 1], [], []>} : vector<8x1024xf32>, vector<1024x32xf32>, vector<8x32xf32> -> vector<8x32xf32>
    %53 = arith.addf %51, %52 : vector<8x32xf32>
    %c0_23 = arith.constant 0 : index
    %c0_24 = arith.constant 0 : index
    %54 = vector.load %arg9[%c0_23, %c0_24] : memref<8x32xf32, #tpu.memory_space<vmem>>, vector<8x32xf32>
    tpu.vector_store %arg9[%c0_23, %c0_24], %53 {strides = array<i32>} : memref<8x32xf32, #tpu.memory_space<vmem>>, vector<8x32xf32>,
    %c0_25 = arith.constant 0 : index
    %c0_26 = arith.constant 0 : index
    %55 = vector.load %arg7[%c0_25, %c0_26] : memref<8x1xf32, #tpu.memory_space<vmem>>, vector<8x1xf32>
    tpu.vector_store %arg7[%c0_25, %c0_26], %34 {strides = array<i32>} : memref<8x1xf32, #tpu.memory_space<vmem>>, vector<8x1xf32>,
    %c0_i32_27 = arith.constant 0 : i32
    %56 = arith.cmpi eq, %arg1, %c0_i32_27 : i32
    %57 = arith.extui %56 : i1 to i32
    %c0_i32_28 = arith.constant 0 : i32
    %58 = arith.cmpi ne, %57, %c0_i32_28 : i32
    scf.if %58 {
      %c0_29 = arith.constant 0 : index
      %c0_30 = arith.constant 0 : index
      %59 = vector.load %arg9[%c0_29, %c0_30] : memref<8x32xf32, #tpu.memory_space<vmem>>, vector<8x32xf32>
      %c0_31 = arith.constant 0 : index
      %c0_32 = arith.constant 0 : index
      %60 = vector.load %arg8[%c0_31, %c0_32] : memref<8x1xf32, #tpu.memory_space<vmem>>, vector<8x1xf32>
      %cst_33 = arith.constant 1.000000e-16 : f32
      %61 = vector.broadcast %cst_33 : f32 to vector<8x1xf32>
      %62 = arith.addf %60, %61 : vector<8x1xf32>
      %63 = vector.broadcast %62 : vector<8x1xf32> to vector<8x32xf32>
      %64 = arith.divf %59, %63 : vector<8x32xf32>
      %c0_34 = arith.constant 0 : index
      %c0_35 = arith.constant 0 : index
      %65 = vector.load %arg6[%c0_34, %c0_35] : memref<8x32xf32, #tpu.memory_space<vmem>>, vector<8x32xf32>
      tpu.vector_store %arg6[%c0_34, %c0_35], %64 {strides = array<i32>} : memref<8x32xf32, #tpu.memory_space<vmem>>, vector<8x32xf32>,
    } else {
    }
    return
  }
  func.func @transform_0(%arg0: i32, %arg1: i32) -> (i32, i32) {
    %c0_i32 = arith.constant 0 : i32
    %c0_i32_0 = arith.constant 0 : i32
    return %c0_i32, %arg1 : i32, i32
  }
  func.func @transform_1(%arg0: i32, %arg1: i32) -> (i32, i32) {
    %c0_i32 = arith.constant 0 : i32
    %c0_i32_0 = arith.constant 0 : i32
    return %arg1, %c0_i32 : i32, i32
  }
  func.func @transform_2(%arg0: i32, %arg1: i32) -> (i32, i32) {
    %c0_i32 = arith.constant 0 : i32
    %c0_i32_0 = arith.constant 0 : i32
    %c0_i32_1 = arith.constant 0 : i32
    return %c0_i32, %c0_i32_0 : i32, i32
  }
  func.func @transform_3(%arg0: i32, %arg1: i32) -> (i32, i32) {
    %c0_i32 = arith.constant 0 : i32
    %c0_i32_0 = arith.constant 0 : i32
    %c0_i32_1 = arith.constant 0 : i32
    return %c0_i32, %c0_i32_0 : i32, i32
  }
  func.func @transform_4(%arg0: i32, %arg1: i32) -> (i32, i32) {
    %c0_i32 = arith.constant 0 : i32
    %c0_i32_0 = arith.constant 0 : i32
    return %arg0, %c0_i32 : i32, i32
  }
}

</mosaic_0001>

<bundles_post_ra>
// kernel: tpu_custom_call.1
= control target key start
LH: loop header
LB: loop body
LE: loop exit
PB: predicated region body
PF: predicated region fallthrough
CT: control target
= control target key end

     0   :  { %vm25_vm0 = vcmask 261120   ;;  %v2495_v41 = vmov 0   ;;  %s3574_s0 = inlined_call_operand.vmem [shape: s32[1,1024], index: 0, kind: input, shape index: {}]   ;;  %s3575_s1 = inlined_call_operand.vmem [shape: f32[1024,32], index: 1, kind: input, shape index: {}]   ;;  %s3576_s2 = inlined_call_operand.vmem [shape: f32[32,32], index: 2, kind: input, shape index: {}]   ;;  %s3577_s3 = inlined_call_operand.vmem [shape: f32[16,1], index: 3, kind: input, shape index: {}]   ;;  %s3578_s4 = inlined_call_operand.hbm [shape: f32[8,32], index: 4, kind: output, shape index: {}]  }
   0x1   :  { %v43_v0 = vld [vmem:[%s3575_s1 + $0x80] sm:$0xff]  ;;  %v44_v1 = vld [vmem:[%s3575_s1 + $0x88] sm:$0xff]  ;;  %vm2537_vm1 = vmpackc.low %vm25_vm0, %vm25_vm0  ;;  %2353 = vset.pattern.permute.xlu0 %v2495_v41  ;;  %2354 = vset.pattern.permute.xlu1 %v2495_v41 }
   0x2   :  { %v75_v2 = vld [vmem:[%s3575_s1 + $0x180] sm:$0xff]  ;;  %v2533_v3 = vpack.c.bf16 %v44_v1, %v43_v0  ;;  %v76_v5 = vld [vmem:[%s3575_s1 + $0x188] sm:$0xff]  ;;  %v45_v13 = vld [vmem:[%s3575_s1 + $0x90] sm:$0xff] }
   0x3   :  { %v27_v6 = vld [vmem:[%s3575_s1] sm:$0xff]  ;;  %v2547_v7 = vpack.c.bf16 %v76_v5, %v75_v2  ;;  %v28_v8 = vld [vmem:[%s3575_s1 + $0x8] sm:$0xff]  ;;  %v46_v14 = vld [vmem:[%s3575_s1 + $0x98] sm:$0xff] }
   0x4   :  { %v59_v9 = vld [vmem:[%s3575_s1 + $0x100] sm:$0xff]  ;;  %v60_v10 = vld [vmem:[%s3575_s1 + $0x108] sm:$0xff]  ;;  %2031 = vmatprep.subr.msk.bf16.mxu0 %vm2537_vm1, %v2533_v3  ;;  %v2561_v11 = vpack.c.bf16 %v28_v8, %v27_v6  ;;  %v77_v15 = vld [vmem:[%s3575_s1 + $0x190] sm:$0xff]  ;;  %v2577_v16 = vpack.c.bf16 %v46_v14, %v45_v13 }
   0x5   :  { %v2563_v12 = vpack.c.bf16 %v60_v10, %v59_v9  ;;  %2079 = vmatprep.subr.msk.bf16.mxu1 %vm2537_vm1, %v2547_v7  ;;  %v78_v17 = vld [vmem:[%s3575_s1 + $0x198] sm:$0xff]  ;;  %v29_v19 = vld [vmem:[%s3575_s1 + $0x10] sm:$0xff]  ;;  %v47_v23 = vld [vmem:[%s3575_s1 + $0xa0] sm:$0xff] }
   0x6   :  { %2034 = vmatpush3.bf16.xpose.msk.msra.mxu0 %vm2537_vm1, %v2561_v11  ;;  %v2588_v18 = vpack.c.bf16 %v78_v17, %v77_v15  ;;  %v30_v20 = vld [vmem:[%s3575_s1 + $0x18] sm:$0xff]  ;;  %v61_v21 = vld [vmem:[%s3575_s1 + $0x110] sm:$0xff]  ;;  %v48_v24 = vld [vmem:[%s3575_s1 + $0xa8] sm:$0xff] }
   0x7   :  { %2082 = vmatpush3.bf16.xpose.msk.msra.mxu1 %vm2537_vm1, %v2563_v12  ;;  %2037 = vmatprep.subr.msk.bf16.mxu0 %vm2537_vm1, %v2577_v16  ;;  %v62_v22 = vld [vmem:[%s3575_s1 + $0x118] sm:$0xff]  ;;  %v79_v25 = vld [vmem:[%s3575_s1 + $0x1a0] sm:$0xff]  ;;  %v80_v26 = vld [vmem:[%s3575_s1 + $0x1a8] sm:$0xff]  ;;  %v2620_v27 = vpack.c.bf16 %v30_v20, %v29_v19  ;;  %v2624_v29 = vpack.c.bf16 %v48_v24, %v47_v23 }
   0x8   :  { %2085 = vmatprep.subr.msk.bf16.mxu1 %vm2537_vm1, %v2588_v18  ;;  %v2622_v28 = vpack.c.bf16 %v62_v22, %v61_v21  ;;  %v2626_v30 = vpack.c.bf16 %v80_v26, %v79_v25  ;;  %v31_v31 = vld [vmem:[%s3575_s1 + $0x20] sm:$0xff]  ;;  %v32_v32 = vld [vmem:[%s3575_s1 + $0x28] sm:$0xff]  ;;  %v49_v35 = vld [vmem:[%s3575_s1 + $0xb0] sm:$0xff] }
   0x9   :  { %v63_v33 = vld [vmem:[%s3575_s1 + $0x120] sm:$0xff]  ;;  %v64_v34 = vld [vmem:[%s3575_s1 + $0x128] sm:$0xff]  ;;  %v50_v36 = vld [vmem:[%s3575_s1 + $0xb8] sm:$0xff]  ;;  %v2664_v39 = vpack.c.bf16 %v32_v32, %v31_v31 }
   0xa   :  { %v81_v37 = vld [vmem:[%s3575_s1 + $0x1b0] sm:$0xff]  ;;  %v82_v38 = vld [vmem:[%s3575_s1 + $0x1b8] sm:$0xff]  ;;  %v2666_v40 = vpack.c.bf16 %v64_v34, %v63_v33  ;;  %v2668_v42 = vpack.c.bf16 %v50_v36, %v49_v35  ;;  %v2687_v46 = vld [vmem:[%s3576_s2] sm:$0xff] }
   0xb   :  { %v2670_v43 = vpack.c.bf16 %v82_v38, %v81_v37  ;;  %v33_v44 = vld [vmem:[%s3575_s1 + $0x30] sm:$0xff]  ;;  %v34_v45 = vld [vmem:[%s3575_s1 + $0x38] sm:$0xff]  ;;  %v51_v49 = vld [vmem:[%s3575_s1 + $0xc0] sm:$0xff]  ;;  %1761 = vmatprep.mubr.msk.f32.mxu0 %vm25_vm0, %v2687_v46  ;;  %1801 = vmatprep.mubr.msk.f32.mxu1 %vm25_vm0, %v2687_v46 }
   0xc   :  { %v65_v47 = vld [vmem:[%s3575_s1 + $0x130] sm:$0xff]  ;;  %v66_v48 = vld [vmem:[%s3575_s1 + $0x138] sm:$0xff]  ;;  %v52_v50 = vld [vmem:[%s3575_s1 + $0xc8] sm:$0xff]  ;;  %v2717_v53 = vpack.c.bf16 %v34_v45, %v33_v44 }
   0xd   :  { %v83_v51 = vld [vmem:[%s3575_s1 + $0x1c0] sm:$0xff]  ;;  %v84_v52 = vld [vmem:[%s3575_s1 + $0x1c8] sm:$0xff]  ;;  %v2719_v54 = vpack.c.bf16 %v66_v48, %v65_v47  ;;  %v2721_v55 = vpack.c.bf16 %v52_v50, %v51_v49  ;;  %v53_v61 = vld [vmem:[%s3575_s1 + $0xd0] sm:$0xff] }
   0xe   :  { %2040 = vmatpush3.bf16.xpose.msk.msra.mxu0 %vm2537_vm1, %v2620_v27  ;;  %v2723_v56 = vpack.c.bf16 %v84_v52, %v83_v51  ;;  %v35_v57 = vld [vmem:[%s3575_s1 + $0x40] sm:$0xff]  ;;  %v36_v58 = vld [vmem:[%s3575_s1 + $0x48] sm:$0xff]  ;;  %v54_v62 = vld [vmem:[%s3575_s1 + $0xd8] sm:$0xff] }
   0xf   :  { %2088 = vmatpush3.bf16.xpose.msk.msra.mxu1 %vm2537_vm1, %v2622_v28  ;;  %2043 = vmatprep.subr.msk.bf16.mxu0 %vm2537_vm1, %v2624_v29  ;;  %v67_v59 = vld [vmem:[%s3575_s1 + $0x140] sm:$0xff]  ;;  %v68_v60 = vld [vmem:[%s3575_s1 + $0x148] sm:$0xff]  ;;  %v85_v63 = vld [vmem:[%s3575_s1 + $0x1d0] sm:$0xff]  ;;  %v2761_v1 = vpack.c.bf16 %v36_v58, %v35_v57  ;;  %v2765_v5 = vpack.c.bf16 %v54_v62, %v53_v61 }
  0x10   :  { %2091 = vmatprep.subr.msk.bf16.mxu1 %vm2537_vm1, %v2626_v30  ;;  %v86_v0 = vld [vmem:[%s3575_s1 + $0x1d8] sm:$0xff]  ;;  %v2763_v2 = vpack.c.bf16 %v68_v60, %v67_v59  ;;  %v37_v8 = vld [vmem:[%s3575_s1 + $0x50] sm:$0xff]  ;;  %v55_v14 = vld [vmem:[%s3575_s1 + $0xe0] sm:$0xff] }
  0x11   :  { %v2767_v6 = vpack.c.bf16 %v86_v0, %v85_v63  ;;  %v38_v9 = vld [vmem:[%s3575_s1 + $0x58] sm:$0xff]  ;;  %v69_v10 = vld [vmem:[%s3575_s1 + $0x150] sm:$0xff]  ;;  %v56_v15 = vld [vmem:[%s3575_s1 + $0xe8] sm:$0xff] }
  0x12   :  { %v70_v13 = vld [vmem:[%s3575_s1 + $0x158] sm:$0xff]  ;;  %v87_v17 = vld [vmem:[%s3575_s1 + $0x1e0] sm:$0xff]  ;;  %v88_v19 = vld [vmem:[%s3575_s1 + $0x1e8] sm:$0xff]  ;;  %v2805_v20 = vpack.c.bf16 %v38_v9, %v37_v8  ;;  %v2809_v22 = vpack.c.bf16 %v56_v15, %v55_v14 }
  0x13   :  { %v2807_v21 = vpack.c.bf16 %v70_v13, %v69_v10  ;;  %v2811_v23 = vpack.c.bf16 %v88_v19, %v87_v17  ;;  %v1040_v24 = vld [vmem:[%s3577_s3] sm:$0xff]  ;;  %v40_v26 = vld [vmem:[%s3575_s1 + $0x68] sm:$0xff] }
  0x14   :  { %v39_v25 = vld [vmem:[%s3575_s1 + $0x60] sm:$0xff] }
  0x16   :  { %2046 = vmatpush3.bf16.xpose.msk.msra.mxu0 %vm2537_vm1, %v2664_v39 }
  0x17   :  { %2094 = vmatpush3.bf16.xpose.msk.msra.mxu1 %vm2537_vm1, %v2666_v40  ;;  %2049 = vmatprep.subr.msk.bf16.mxu0 %vm2537_vm1, %v2668_v42 }
  0x18   :  { %2097 = vmatprep.subr.msk.bf16.mxu1 %vm2537_vm1, %v2670_v43 }
  0x1e   :  { %2052 = vmatpush3.bf16.xpose.msk.msra.mxu0 %vm2537_vm1, %v2717_v53 }
  0x1f   :  { %2100 = vmatpush3.bf16.xpose.msk.msra.mxu1 %vm2537_vm1, %v2719_v54  ;;  %2055 = vmatprep.subr.msk.bf16.mxu0 %vm2537_vm1, %v2721_v55 }
  0x20   :  { %2103 = vmatprep.subr.msk.bf16.mxu1 %vm2537_vm1, %v2723_v56 }
  0x26   :  { %2058 = vmatpush3.bf16.xpose.msk.msra.mxu0 %vm2537_vm1, %v2761_v1 }
  0x27   :  { %2106 = vmatpush3.bf16.xpose.msk.msra.mxu1 %vm2537_vm1, %v2763_v2  ;;  %2061 = vmatprep.subr.msk.bf16.mxu0 %vm2537_vm1, %v2765_v5 }
  0x28   :  { %2109 = vmatprep.subr.msk.bf16.mxu1 %vm2537_vm1, %v2767_v6 }
  0x2e   :  { %2064 = vmatpush3.bf16.xpose.msk.msra.mxu0 %vm2537_vm1, %v2805_v20 }
  0x2f   :  { %2112 = vmatpush3.bf16.xpose.msk.msra.mxu1 %vm2537_vm1, %v2807_v21 }
  0x30   :  { %9 = vsyncpa [#allocation6], 0  ;;  %2067 = vmatprep.subr.msk.bf16.mxu0 %vm2537_vm1, %v2809_v22  ;;  %2115 = vmatprep.subr.msk.bf16.mxu1 %vm2537_vm1, %v2811_v23  ;;  %v71_v31 = vld [vmem:[%s3575_s1 + $0x160] sm:$0xff]  ;;  %v72_v32 = vld [vmem:[%s3575_s1 + $0x168] sm:$0xff]  ;;  %v2855_v38 = vpack.c.bf16 %v40_v26, %v39_v25  ;;  %vm22_vm10 = vcmask 7168  }
  0x31   :  { %v57_v33 = vld [vmem:[%s3575_s1 + $0xf0] sm:$0xff]  ;;  %v58_v34 = vld [vmem:[%s3575_s1 + $0xf8] sm:$0xff]  ;;  %1044 = vperm.xlu0 %2353, %v1040_v24   ;;  %v1041_v37 = vld [vmem:[%s3577_s3 + $0x8] sm:$0xff]  ;;  %v2857_v41 = vpack.c.bf16 %v72_v32, %v71_v31 }
  0x32   :  { %v89_v35 = vld [vmem:[%s3575_s1 + $0x1f0] sm:$0xff]  ;;  %v90_v36 = vld [vmem:[%s3575_s1 + $0x1f8] sm:$0xff]  ;;  %v2859_v44 = vpack.c.bf16 %v58_v34, %v57_v33  ;;  %v107_v51 = vld [vmem:[%s3575_s1 + $0x280] sm:$0xff] }
  0x33   :  { %v2861_v45 = vpack.c.bf16 %v90_v36, %v89_v35  ;;  %v41_v47 = vld [vmem:[%s3575_s1 + $0x70] sm:$0xff]  ;;  %v42_v48 = vld [vmem:[%s3575_s1 + $0x78] sm:$0xff]  ;;  %v108_v52 = vld [vmem:[%s3575_s1 + $0x288] sm:$0xff] }
  0x34   :  { %v73_v49 = vld [vmem:[%s3575_s1 + $0x170] sm:$0xff]  ;;  %v74_v50 = vld [vmem:[%s3575_s1 + $0x178] sm:$0xff]  ;;  %v139_v57 = vld [vmem:[%s3575_s1 + $0x380] sm:$0xff]  ;;  %v2899_v59 = vpack.c.bf16 %v42_v48, %v41_v47  ;;  %v2903_v61 = vpack.c.bf16 %v108_v52, %v107_v51 }
  0x35   :  { %1049 = vperm.xlu0 %2353, %v1041_v37   ;;  %v140_v58 = vld [vmem:[%s3575_s1 + $0x388] sm:$0xff]  ;;  %v2901_v60 = vpack.c.bf16 %v74_v50, %v73_v49  ;;  %v91_v63 = vld [vmem:[%s3575_s1 + $0x200] sm:$0xff]  ;;  %v109_v10 = vld [vmem:[%s3575_s1 + $0x290] sm:$0xff] }
  0x36   :  { %2070 = vmatpush3.bf16.xpose.msk.msra.mxu0 %vm2537_vm1, %v2855_v38  ;;  %v2905_v62 = vpack.c.bf16 %v140_v58, %v139_v57  ;;  %v92_v0 = vld [vmem:[%s3575_s1 + $0x208] sm:$0xff]  ;;  %v123_v8 = vld [vmem:[%s3575_s1 + $0x300] sm:$0xff]  ;;  %v110_v13 = vld [vmem:[%s3575_s1 + $0x298] sm:$0xff] }
  0x37   :  { %2118 = vmatpush3.bf16.xpose.msk.msra.mxu1 %vm2537_vm1, %v2857_v41  ;;  %2073 = vmatprep.subr.msk.bf16.mxu0 %vm2537_vm1, %v2859_v44  ;;  %v124_v9 = vld [vmem:[%s3575_s1 + $0x308] sm:$0xff]  ;;  %v141_v14 = vld [vmem:[%s3575_s1 + $0x390] sm:$0xff]  ;;  %v142_v15 = vld [vmem:[%s3575_s1 + $0x398] sm:$0xff]  ;;  %v2943_v17 = vpack.c.bf16 %v92_v0, %v91_v63  ;;  %v2952_v25 = vpack.c.bf16 %v110_v13, %v109_v10 }
  0x38   :  { %2121 = vmatprep.subr.msk.bf16.mxu1 %vm2537_vm1, %v2861_v45  ;;  %v2945_v19 = vpack.c.bf16 %v124_v9, %v123_v8  ;;  %v2950_v24 = vld [vmem:[%s3576_s2 + $0x8] sm:$0xff]  ;;  %v2954_v26 = vpack.c.bf16 %v142_v15, %v141_v14  ;;  %v2969_v31 = vld [vmem:[%s3576_s2 + $0x10] sm:$0xff]  ;;  %v94_v33 = vld [vmem:[%s3575_s1 + $0x218] sm:$0xff] }
  0x39   :  { %v93_v32 = vld [vmem:[%s3575_s1 + $0x210] sm:$0xff]  ;;  %v126_v35 = vld [vmem:[%s3575_s1 + $0x318] sm:$0xff]  ;;  %v111_v36 = vld [vmem:[%s3575_s1 + $0x2a0] sm:$0xff] }
  0x3a   :  { %v125_v34 = vld [vmem:[%s3575_s1 + $0x310] sm:$0xff]  ;;  %v112_v37 = vld [vmem:[%s3575_s1 + $0x2a8] sm:$0xff]  ;;  %v143_v47 = vld [vmem:[%s3575_s1 + $0x3a0] sm:$0xff]  ;;  %v3013_v49 = vpack.c.bf16 %v94_v33, %v93_v32 }
  0x3b   :  { %v144_v48 = vld [vmem:[%s3575_s1 + $0x3a8] sm:$0xff]  ;;  %v3015_v50 = vpack.c.bf16 %v126_v35, %v125_v34  ;;  %v3020_v51 = vld [vmem:[%s3576_s2 + $0x18] sm:$0xff]  ;;  %v3022_v52 = vpack.c.bf16 %v112_v37, %v111_v36  ;;  %v95_v58 = vld [vmem:[%s3575_s1 + $0x220] sm:$0xff] }
  0x3c   :  { %v3024_v57 = vpack.c.bf16 %v144_v48, %v143_v47  ;;  %v96_v63 = vld [vmem:[%s3575_s1 + $0x228] sm:$0xff]  ;;  %v127_v0 = vld [vmem:[%s3575_s1 + $0x320] sm:$0xff]  ;;  %v113_v9 = vld [vmem:[%s3575_s1 + $0x2b0] sm:$0xff] }
  0x3d   :  { %v128_v8 = vld [vmem:[%s3575_s1 + $0x328] sm:$0xff]  ;;  %v114_v10 = vld [vmem:[%s3575_s1 + $0x2b8] sm:$0xff]  ;;  %v145_v13 = vld [vmem:[%s3575_s1 + $0x3b0] sm:$0xff]  ;;  %v3074_v15 = vpack.c.bf16 %v96_v63, %v95_v58 }
  0x3e   :  { %2076 = vmatpush3.bf16.xpose.msk.msra.mxu0 %vm2537_vm1, %v2899_v59  ;;  %v146_v14 = vld [vmem:[%s3575_s1 + $0x3b8] sm:$0xff]  ;;  %v3076_v32 = vpack.c.bf16 %v128_v8, %v127_v0  ;;  %v3082_v33 = vpack.c.bf16 %v114_v10, %v113_v9  ;;  %v97_v35 = vld [vmem:[%s3575_s1 + $0x230] sm:$0xff]  ;;  %v115_v48 = vld [vmem:[%s3575_s1 + $0x2c0] sm:$0xff] }
  0x3f   :  { %2124 = vmatpush3.bf16.xpose.msk.msra.mxu1 %vm2537_vm1, %v2901_v60  ;;  %2127 = vmatprep.subr.msk.bf16.mxu0 %vm2537_vm1, %v2903_v61  ;;  %v3084_v34 = vpack.c.bf16 %v146_v14, %v145_v13  ;;  %v98_v36 = vld [vmem:[%s3575_s1 + $0x238] sm:$0xff]  ;;  %v129_v37 = vld [vmem:[%s3575_s1 + $0x330] sm:$0xff]  ;;  %v116_v58 = vld [vmem:[%s3575_s1 + $0x2c8] sm:$0xff] }
  0x40   :  { %2175 = vmatprep.subr.msk.bf16.mxu1 %vm2537_vm1, %v2905_v62  ;;  %v130_v47 = vld [vmem:[%s3575_s1 + $0x338] sm:$0xff]  ;;  %v147_v63 = vld [vmem:[%s3575_s1 + $0x3c0] sm:$0xff]  ;;  %v148_v0 = vld [vmem:[%s3575_s1 + $0x3c8] sm:$0xff]  ;;  %v3122_v8 = vpack.c.bf16 %v98_v36, %v97_v35  ;;  %v3126_v10 = vpack.c.bf16 %v116_v58, %v115_v48 }
  0x41   :  { %v3124_v9 = vpack.c.bf16 %v130_v47, %v129_v37  ;;  %v3128_v13 = vpack.c.bf16 %v148_v0, %v147_v63  ;;  %v99_v14 = vld [vmem:[%s3575_s1 + $0x240] sm:$0xff]  ;;  %v100_v35 = vld [vmem:[%s3575_s1 + $0x248] sm:$0xff]  ;;  %v117_v47 = vld [vmem:[%s3575_s1 + $0x2d0] sm:$0xff] }
  0x42   :  { %3593 = vst [vmem:[#allocation8_spill] sm:$0xff] %v3122_v8  ;;  %3595 = vst [vmem:[#allocation10_spill] sm:$0xff] %v3126_v10  ;;  %v131_v36 = vld [vmem:[%s3575_s1 + $0x340] sm:$0xff]  ;;  %v132_v37 = vld [vmem:[%s3575_s1 + $0x348] sm:$0xff]  ;;  %v3166_v0 = vpack.c.bf16 %v100_v35, %v99_v14 }
  0x43   :  { %3594 = vst [vmem:[#allocation9_spill] sm:$0xff] %v3124_v9  ;;  %3596 = vst [vmem:[#allocation11_spill] sm:$0xff] %v3128_v13  ;;  %v118_v48 = vld [vmem:[%s3575_s1 + $0x2d8] sm:$0xff]  ;;  %v149_v58 = vld [vmem:[%s3575_s1 + $0x3d0] sm:$0xff] }
  0x44   :  { %v150_v63 = vld [vmem:[%s3575_s1 + $0x3d8] sm:$0xff]  ;;  %3597 = vst [vmem:[#allocation12_spill] sm:$0xff] %v3166_v0  ;;  %v133_v35 = vld [vmem:[%s3575_s1 + $0x350] sm:$0xff] }
  0x45   :  { %1762 = vmatmul.mubr.msk.f32.vlgmr.msra.gmra.mrb[0].mxu0 %vm25_vm0, %v2687_v46  ;;  %v102_v14 = vld [vmem:[%s3575_s1 + $0x258] sm:$0xff] }
  0x46   :  { %1802 = vmatmul.mubr.msk.f32.vlgmr.msra.gmra.mrb[0].mxu1 %vm25_vm0, %v2687_v46  ;;  %2130 = vmatpush3.bf16.xpose.msk.msra.mxu0 %vm2537_vm1, %v2943_v17 }
  0x47   :  { %2178 = vmatpush3.bf16.xpose.msk.msra.mxu1 %vm2537_vm1, %v2945_v19  ;;  %1763 = vmatprep.mubr.msk.f32.mxu0 %vm25_vm0, %v2950_v24 }
  0x48   :  { %1803 = vmatprep.mubr.msk.f32.mxu1 %vm25_vm0, %v2950_v24  ;;  %2133 = vmatprep.subr.msk.bf16.mxu0 %vm2537_vm1, %v2952_v25 }
  0x49   :  { %2181 = vmatprep.subr.msk.bf16.mxu1 %vm2537_vm1, %v2954_v26  ;;  %1764 = vmatmul.mubr.msk.f32.gmra.mrb[2].mxu0 %vm25_vm0, %v2950_v24 }
  0x4a   :  { %1804 = vmatmul.mubr.msk.f32.gmra.mrb[2].mxu1 %vm25_vm0, %v2950_v24  ;;  %1765 = vmatprep.mubr.msk.f32.mxu0 %vm25_vm0, %v2969_v31 }
  0x4b   :  { %1805 = vmatprep.mubr.msk.f32.mxu1 %vm25_vm0, %v2969_v31 }
  0x4d   :  { %1766 = vmatmul.mubr.msk.f32.gmra.mrb[4].mxu0 %vm25_vm0, %v2969_v31 }
  0x4e   :  { %1806 = vmatmul.mubr.msk.f32.gmra.mrb[4].mxu1 %vm25_vm0, %v2969_v31  ;;  %2136 = vmatpush3.bf16.xpose.msk.msra.mxu0 %vm2537_vm1, %v3013_v49 }
  0x4f   :  { %2184 = vmatpush3.bf16.xpose.msk.msra.mxu1 %vm2537_vm1, %v3015_v50  ;;  %1767 = vmatprep.mubr.msk.f32.mxu0 %vm25_vm0, %v3020_v51 }
  0x50   :  { %1807 = vmatprep.mubr.msk.f32.mxu1 %vm25_vm0, %v3020_v51  ;;  %2139 = vmatprep.subr.msk.bf16.mxu0 %vm2537_vm1, %v3022_v52 }
  0x51   :  { %2187 = vmatprep.subr.msk.bf16.mxu1 %vm2537_vm1, %v3024_v57  ;;  %1768 = vmatmul.mubr.msk.f32.gmra.mrb[6].mxu0 %vm25_vm0, %v3020_v51 }
  0x52   :  { %1808 = vmatmul.mubr.msk.f32.gmra.mrb[6].mxu1 %vm25_vm0, %v3020_v51  ;;  %1841 = vmatprep.mubr.msk.f32.mxu0 %vm25_vm0, %v2687_v46 }
  0x53   :  { %1881 = vmatprep.mubr.msk.f32.mxu1 %vm25_vm0, %v2687_v46 }
  0x56   :  { %2142 = vmatpush3.bf16.xpose.msk.msra.mxu0 %vm2537_vm1, %v3074_v15 }
  0x57   :  { %2190 = vmatpush3.bf16.xpose.msk.msra.mxu1 %vm2537_vm1, %v3076_v32  ;;  %2145 = vmatprep.subr.msk.bf16.mxu0 %vm2537_vm1, %v3082_v33 }
  0x58   :  { %2193 = vmatprep.subr.msk.bf16.mxu1 %vm2537_vm1, %v3084_v34 }
  0x5e   :  { %2148 = vmatpush3.bf16.xpose.msk.msra.mxu0 %vm2537_vm1, %v3122_v8  ;;  %v101_v8 = vld [vmem:[%s3575_s1 + $0x250] sm:$0xff] }
  0x5f   :  { %2196 = vmatpush3.bf16.xpose.msk.msra.mxu1 %vm2537_vm1, %v3124_v9  ;;  %2151 = vmatprep.subr.msk.bf16.mxu0 %vm2537_vm1, %v3126_v10  ;;  %v3170_v9 = vpack.c.bf16 %v118_v48, %v117_v47  ;;  %v3172_v10 = vpack.c.bf16 %v150_v63, %v149_v58  ;;  %v120_v47 = vld [vmem:[%s3575_s1 + $0x2e8] sm:$0xff]  ;;  %v151_v48 = vld [vmem:[%s3575_s1 + $0x3e0] sm:$0xff]  ;;  %v3210_v63 = vpack.c.bf16 %v102_v14, %v101_v8 }
  0x60   :  { %2199 = vmatprep.subr.msk.bf16.mxu1 %vm2537_vm1, %v3128_v13  ;;  %v3168_v13 = vpack.c.bf16 %v132_v37, %v131_v36  ;;  %v134_v36 = vld [vmem:[%s3575_s1 + $0x358] sm:$0xff]  ;;  %v119_v37 = vld [vmem:[%s3575_s1 + $0x2e0] sm:$0xff]  ;;  %v152_v58 = vld [vmem:[%s3575_s1 + $0x3e8] sm:$0xff] }
  0x61   :  { %3599 = vst [vmem:[#allocation14_spill] sm:$0xff] %v3170_v9  ;;  %3600 = vst [vmem:[#allocation15_spill] sm:$0xff] %v3172_v10  ;;  %v104_v8 = vld [vmem:[%s3575_s1 + $0x268] sm:$0xff]  ;;  %v135_v14 = vld [vmem:[%s3575_s1 + $0x360] sm:$0xff] }
  0x62   :  { %3598 = vst [vmem:[#allocation13_spill] sm:$0xff] %v3168_v13  ;;  %3601 = vst [vmem:[#allocation16_spill] sm:$0xff] %v3210_v63 }
  0x66   :  { %2154 = vmatpush3.bf16.xpose.msk.msra.mxu0 %vm2537_vm1, %v3166_v0  ;;  %v103_v0 = vld [vmem:[%s3575_s1 + $0x260] sm:$0xff] }
  0x67   :  { %2202 = vmatpush3.bf16.xpose.msk.msra.mxu1 %vm2537_vm1, %v3168_v13  ;;  %2157 = vmatprep.subr.msk.bf16.mxu0 %vm2537_vm1, %v3170_v9  ;;  %v3214_v13 = vpack.c.bf16 %v120_v47, %v119_v37  ;;  %v3216_v9 = vpack.c.bf16 %v152_v58, %v151_v48  ;;  %v122_v37 = vld [vmem:[%s3575_s1 + $0x2f8] sm:$0xff]  ;;  %v153_v47 = vld [vmem:[%s3575_s1 + $0x3f0] sm:$0xff]  ;;  %v3254_v58 = vpack.c.bf16 %v104_v8, %v103_v0 }
  0x68   :  { %2205 = vmatprep.subr.msk.bf16.mxu1 %vm2537_vm1, %v3172_v10  ;;  %v3212_v10 = vpack.c.bf16 %v134_v36, %v133_v35  ;;  %v136_v35 = vld [vmem:[%s3575_s1 + $0x368] sm:$0xff]  ;;  %v121_v36 = vld [vmem:[%s3575_s1 + $0x2f0] sm:$0xff]  ;;  %v154_v48 = vld [vmem:[%s3575_s1 + $0x3f8] sm:$0xff] }
  0x69   :  { %3603 = vst [vmem:[#allocation18_spill] sm:$0xff] %v3214_v13  ;;  %3604 = vst [vmem:[#allocation19_spill] sm:$0xff] %v3216_v9  ;;  %v106_v0 = vld [vmem:[%s3575_s1 + $0x278] sm:$0xff]  ;;  %v137_v8 = vld [vmem:[%s3575_s1 + $0x370] sm:$0xff] }
  0x6a   :  { %3602 = vst [vmem:[#allocation17_spill] sm:$0xff] %v3212_v10 }
  0x6e   :  { %2160 = vmatpush3.bf16.xpose.msk.msra.mxu0 %vm2537_vm1, %v3210_v63  ;;  %v105_v63 = vld [vmem:[%s3575_s1 + $0x270] sm:$0xff] }
  0x6f   :  { %2208 = vmatpush3.bf16.xpose.msk.msra.mxu1 %vm2537_vm1, %v3212_v10  ;;  %2163 = vmatprep.subr.msk.bf16.mxu0 %vm2537_vm1, %v3214_v13  ;;  %v3258_v10 = vpack.c.bf16 %v122_v37, %v121_v36  ;;  %v3260_v13 = vpack.c.bf16 %v154_v48, %v153_v47 }
  0x70   :  { %2211 = vmatprep.subr.msk.bf16.mxu1 %vm2537_vm1, %v3216_v9  ;;  %v3256_v9 = vpack.c.bf16 %v136_v35, %v135_v14  ;;  %v138_v14 = vld [vmem:[%s3575_s1 + $0x378] sm:$0xff]  ;;  %v3286_v35 = vpack.c.bf16 %v106_v0, %v105_v63 }
  0x71   :  { %v3288_v36 = vpack.c.bf16 %v138_v14, %v137_v8 }
  0x76   :  { %2166 = vmatpush3.bf16.xpose.msk.msra.mxu0 %vm2537_vm1, %v3254_v58 }
  0x77   :  { %2214 = vmatpush3.bf16.xpose.msk.msra.mxu1 %vm2537_vm1, %v3256_v9  ;;  %2169 = vmatprep.subr.msk.bf16.mxu0 %vm2537_vm1, %v3258_v10 }
  0x78   :  { %2217 = vmatprep.subr.msk.bf16.mxu1 %vm2537_vm1, %v3260_v13 }
  0x7e   :  { %2172 = vmatpush3.bf16.xpose.msk.msra.mxu0 %vm2537_vm1, %v3286_v35 }
  0x7f   :  { %2220 = vmatpush3.bf16.xpose.msk.msra.mxu1 %vm2537_vm1, %v3288_v36  ;;  %2222 = vmatprep.subr.bf16.mxu0 %v2533_v3 }
  0x80   :  { %2254 = vmatprep.subr.bf16.mxu1 %v2547_v7 }
  0x85   :  { %1842 = vmatmul.mubr.msk.f32.vlgmr.msra.gmra.mrb[8].mxu0 %vm25_vm0, %v2687_v46 }
  0x86   :  { %1882 = vmatmul.mubr.msk.f32.vlgmr.msra.gmra.mrb[8].mxu1 %vm25_vm0, %v2687_v46  ;;  %1843 = vmatprep.mubr.msk.f32.mxu0 %vm25_vm0, %v2950_v24 }
  0x87   :  { %1883 = vmatprep.mubr.msk.f32.mxu1 %vm25_vm0, %v2950_v24  ;;  %2224 = vmatpush3.bf16.msra.mxu0 %v2561_v11 }
  0x88   :  { %2256 = vmatpush3.bf16.msra.mxu1 %v2563_v12  ;;  %2226 = vmatprep.subr.bf16.mxu0 %v2577_v16 }
  0x89   :  { %2258 = vmatprep.subr.bf16.mxu1 %v2588_v18  ;;  %1844 = vmatmul.mubr.msk.f32.gmra.mrb[10].mxu0 %vm25_vm0, %v2950_v24 }
  0x8a   :  { %1884 = vmatmul.mubr.msk.f32.gmra.mrb[10].mxu1 %vm25_vm0, %v2950_v24  ;;  %1845 = vmatprep.mubr.msk.f32.mxu0 %vm25_vm0, %v2969_v31 }
  0x8b   :  { %1885 = vmatprep.mubr.msk.f32.mxu1 %vm25_vm0, %v2969_v31  ;;  %2228 = vmatpush3.bf16.msra.mxu0 %v2620_v27 }
  0x8c   :  { %2260 = vmatpush3.bf16.msra.mxu1 %v2622_v28  ;;  %2230 = vmatprep.subr.bf16.mxu0 %v2624_v29 }
  0x8d   :  { %2262 = vmatprep.subr.bf16.mxu1 %v2626_v30  ;;  %1846 = vmatmul.mubr.msk.f32.gmra.mrb[12].mxu0 %vm25_vm0, %v2969_v31 }
  0x8e   :  { %1886 = vmatmul.mubr.msk.f32.gmra.mrb[12].mxu1 %vm25_vm0, %v2969_v31  ;;  %1847 = vmatprep.mubr.msk.f32.mxu0 %vm25_vm0, %v3020_v51 }
  0x8f   :  { %1887 = vmatprep.mubr.msk.f32.mxu1 %vm25_vm0, %v3020_v51  ;;  %2232 = vmatpush3.bf16.msra.mxu0 %v2664_v39 }
  0x90   :  { %2264 = vmatpush3.bf16.msra.mxu1 %v2666_v40  ;;  %2234 = vmatprep.subr.bf16.mxu0 %v2668_v42 }
  0x91   :  { %2266 = vmatprep.subr.bf16.mxu1 %v2670_v43  ;;  %1848 = vmatmul.mubr.msk.f32.gmra.mrb[14].mxu0 %vm25_vm0, %v3020_v51 }
  0x92   :  { %1888 = vmatmul.mubr.msk.f32.gmra.mrb[14].mxu1 %vm25_vm0, %v3020_v51 }
  0x93   :  { %2236 = vmatpush3.bf16.msra.mxu0 %v2717_v53 }
  0x94   :  { %2268 = vmatpush3.bf16.msra.mxu1 %v2719_v54  ;;  %2238 = vmatprep.subr.bf16.mxu0 %v2721_v55 }
  0x95   :  { %2270 = vmatprep.subr.bf16.mxu1 %v2723_v56 }
  0x97   :  { %2240 = vmatpush3.bf16.msra.mxu0 %v2761_v1 }
  0x98   :  { %2272 = vmatpush3.bf16.msra.mxu1 %v2763_v2  ;;  %2242 = vmatprep.subr.bf16.mxu0 %v2765_v5 }
  0x99   :  { %2274 = vmatprep.subr.bf16.mxu1 %v2767_v6 }
  0x9b   :  { %2244 = vmatpush3.bf16.msra.mxu0 %v2805_v20 }
  0x9c   :  { %2276 = vmatpush3.bf16.msra.mxu1 %v2807_v21  ;;  %2246 = vmatprep.subr.bf16.mxu0 %v2809_v22 }
  0x9d   :  { %2278 = vmatprep.subr.bf16.mxu1 %v2811_v23 }
  0x9f   :  { %2248 = vmatpush3.bf16.msra.mxu0 %v2855_v38 }
  0xa0   :  { %2280 = vmatpush3.bf16.msra.mxu1 %v2857_v41  ;;  %2250 = vmatprep.subr.bf16.mxu0 %v2859_v44 }
  0xa1   :  { %2282 = vmatprep.subr.bf16.mxu1 %v2861_v45 }
  0xa3   :  { %2252 = vmatpush3.bf16.msra.mxu0 %v2899_v59 }
  0xa4   :  { %2284 = vmatpush3.bf16.msra.mxu1 %v2901_v60  ;;  %2286 = vmatprep.subr.bf16.mxu0 %v2903_v61 }
  0xa5   :  { %2318 = vmatprep.subr.bf16.mxu1 %v2905_v62 }
 0x118   :  { %v622_v3 = vpop.f32.mrb[0].mxu0 }
 0x119   :  { %v711_v4 = vpop.f32.mrb[0].mxu1  ;;  %v624_v7 = vpop.f32.mrb[1].mxu0  ;;  %2355 = vtanh.f32 %v622_v3 }
 0x11a   :  { %v713_v11 = vpop.f32.mrb[1].mxu1  ;;  %2357 = vtanh.f32 %v711_v4  ;;  %v3358_v4 = vpop.permute.xlu0 %1044 }
 0x11b   :  { %2359 = vtanh.f32 %v624_v7 }
 0x11c   :  { %v628_v12 = vpop.f32.mrb[2].mxu0 }
 0x11d   :  { %v717_v16 = vpop.f32.mrb[2].mxu1  ;;  %v630_v18 = vpop.f32.mrb[3].mxu0 }
 0x11e   :  { %v719_v27 = vpop.f32.mrb[3].mxu1 }
 0x120   :  { %v634_v28 = vpop.f32.mrb[4].mxu0 }
 0x121   :  { %v723_v29 = vpop.f32.mrb[4].mxu1  ;;  %v1705_v30 = vmul.f32 -1.442695, %v634_v28  ;;  %v636_v40 = vpop.f32.mrb[5].mxu0 }
 0x122   :  { %v1707_v39 = vmul.f32 -1.442695, %v723_v29  ;;  %v725_v42 = vpop.f32.mrb[5].mxu1  ;;  %v1706_v43 = vmul.f32 -1.442695, %v636_v40  ;;  %v3360_v40 = vpop.permute.xlu0 %1049 }
 0x123   :  { %v1708_v46 = vmul.f32 -1.442695, %v725_v42  ;;  %2361 = vpow2.f32 %v1705_v30  ;;  %v2356_v20 = vpop.eup %2355 }
 0x124   :  { %2363 = vpow2.f32 %v1707_v39  ;;  %v640_v53 = vpop.f32.mrb[6].mxu0  ;;  %v2358_v21 = vpop.eup %2357 }
 0x125   :  { %v729_v54 = vpop.f32.mrb[6].mxu1  ;;  %2365 = vpow2.f32 %v1706_v43  ;;  %v1713_v55 = vmul.f32 -1.442695, %v640_v53  ;;  %v642_v1 = vpop.f32.mrb[7].mxu0 }
 0x126   :  { %v1715_v56 = vmul.f32 -1.442695, %v729_v54  ;;  %v731_v2 = vpop.f32.mrb[7].mxu1  ;;  %2367 = vpow2.f32 %v1708_v46  ;;  %v1714_v5 = vmul.f32 -1.442695, %v642_v1  ;;  %v2360_v22 = vpop.eup %2359 }
 0x127   :  { %v1716_v6 = vmul.f32 -1.442695, %v731_v2  ;;  %2369 = vpow2.f32 %v1713_v55 }
 0x128   :  { %2371 = vpow2.f32 %v1715_v56 }
 0x129   :  { %2373 = vpow2.f32 %v1714_v5 }
 0x12a   :  { %2375 = vpow2.f32 %v1716_v6 }
 0x12b   :  { %2377 = vtanh.f32 %v713_v11 }
 0x12c   :  { %2379 = vtanh.f32 %v628_v12 }
 0x12d   :  { %v2362_v23 = vpop.eup %2361  ;;  %2381 = vtanh.f32 %v717_v16 }
 0x12e   :  { %v2364_v38 = vpop.eup %2363  ;;  %2383 = vtanh.f32 %v630_v18  ;;  %v976_v41 = vadd.f32 1.0, %v2362_v23 }
 0x12f   :  { %v2366_v44 = vpop.eup %2365  ;;  %2385 = vtanh.f32 %v719_v27  ;;  %v978_v45 = vadd.f32 1.0, %v2364_v38 }
 0x130   :  { %v2368_v59 = vpop.eup %2367  ;;  %2387 = vrcp.f32 %v976_v41  ;;  %v977_v60 = vadd.f32 1.0, %v2366_v44 }
 0x131   :  { %v2370_v61 = vpop.eup %2369  ;;  %2389 = vrcp.f32 %v978_v45  ;;  %v979_v62 = vadd.f32 1.0, %v2368_v59 }
 0x132   :  { %v2372_v24 = vpop.eup %2371  ;;  %2391 = vrcp.f32 %v977_v60  ;;  %v984_v31 = vadd.f32 1.0, %v2370_v61 }
 0x133   :  { %v2374_v51 = vpop.eup %2373  ;;  %2393 = vrcp.f32 %v979_v62  ;;  %v986_v63 = vadd.f32 1.0, %v2372_v24 }
 0x134   :  { %v2376_v37 = vpop.eup %2375  ;;  %2395 = vrcp.f32 %v984_v31  ;;  %v985_v47 = vadd.f32 1.0, %v2374_v51 }
 0x135   :  { %v2378_v48 = vpop.eup %2377  ;;  %2397 = vrcp.f32 %v986_v63  ;;  %v987_v0 = vadd.f32 1.0, %v2376_v37 }
 0x136   :  { %v2380_v8 = vpop.eup %2379  ;;  %2399 = vrcp.f32 %v985_v47 }
 0x137   :  { %v2382_v14 = vpop.eup %2381  ;;  %2401 = vrcp.f32 %v987_v0 }
 0x138   :  { %v2384_v3 = vpop.eup %2383 }
 0x139   :  { %v2386_v7 = vpop.eup %2385 }
 0x13a   :  { %v2388_v11 = vpop.eup %2387 }
 0x13b   :  { %v2390_v12 = vpop.eup %2389  ;;  %v1024_v16 = vmul.f32 %v2388_v11, %v2356_v20 }
 0x13c   :  { %v2392_v18 = vpop.eup %2391  ;;  %v1026_v27 = vmul.f32 %v2390_v12, %v2358_v21 }
 0x13d   :  { %v2394_v28 = vpop.eup %2393  ;;  %v1025_v29 = vmul.f32 %v2392_v18, %v2360_v22  ;;  %v1052_v56 = vmul.f32 %v3358_v4, %v1024_v16 }
 0x13e   :  { %v2396_v30 = vpop.eup %2395  ;;  %v1027_v39 = vmul.f32 %v2394_v28, %v2378_v48  ;;  %v1054_v5 = vmul.f32 %v3358_v4, %v1026_v27 }
 0x13f   :  { %v2398_v42 = vpop.eup %2397  ;;  %v1032_v43 = vmul.f32 %v2396_v30, %v2380_v8  ;;  %v1053_v20 = vmul.f32 %v3358_v4, %v1025_v29 }
 0x140   :  { %v2400_v46 = vpop.eup %2399  ;;  %v1034_v53 = vmul.f32 %v2398_v42, %v2382_v14  ;;  %v1055_v23 = vmul.f32 %v3358_v4, %v1027_v39 }
 0x141   :  { %v2402_v54 = vpop.eup %2401  ;;  %v1033_v55 = vmul.f32 %v2400_v46, %v2384_v3  ;;  %v1060_v1 = vmul.f32 %v3360_v40, %v1032_v43 }
 0x142   :  { %v1035_v2 = vmul.f32 %v2402_v54, %v2386_v7  ;;  %v1062_v6 = vmul.f32 %v3360_v40, %v1034_v53 }
 0x143   :  { %v1061_v21 = vmul.f32 %v3360_v40, %v1033_v55  ;;  %v3368_v22 = vadd.f32 %v1060_v1, %v1052_v56 }
 0x144   :  { %v1063_v38 = vmul.f32 %v3360_v40, %v1035_v2  ;;  %v3372_v41 = vadd.f32 %v1062_v6, %v1054_v5 }
 0x145   :  { %v3374_v44 = vadd.f32 %v1061_v21, %v1053_v20 }
 0x146   :  { %v3376_v45 = vadd.f32 %v1063_v38, %v1055_v23 }
 0x158   :  { %v800_v59 = vpop.f32.mrb[8].mxu0 }
 0x159   :  { %v889_v60 = vpop.f32.mrb[8].mxu1  ;;  %v802_v61 = vpop.f32.mrb[9].mxu0  ;;  %2403 = vtanh.f32 %v800_v59  ;;  %v1124_v59 = vlaneseq }
 0x15a   :  { %v891_v62 = vpop.f32.mrb[9].mxu1  ;;  %2405 = vtanh.f32 %v889_v60 }
 0x15b   :  { %2407 = vtanh.f32 %v802_v61 }
 0x15c   :  { %v806_v24 = vpop.f32.mrb[10].mxu0 }
 0x15d   :  { %v895_v31 = vpop.f32.mrb[10].mxu1  ;;  %v808_v51 = vpop.f32.mrb[11].mxu0 }
 0x15e   :  { %v897_v63 = vpop.f32.mrb[11].mxu1 }
 0x160   :  { %v812_v37 = vpop.f32.mrb[12].mxu0 }
 0x161   :  { %v901_v47 = vpop.f32.mrb[12].mxu1  ;;  %v1709_v48 = vmul.f32 -1.442695, %v812_v37  ;;  %v814_v8 = vpop.f32.mrb[13].mxu0 }
 0x162   :  { %v1711_v0 = vmul.f32 -1.442695, %v901_v47  ;;  %v903_v14 = vpop.f32.mrb[13].mxu1  ;;  %v1710_v3 = vmul.f32 -1.442695, %v814_v8  ;;  %v1083_v8 = vrot.slane %v3372_v41, 4 }
 0x163   :  { %v1712_v7 = vmul.f32 -1.442695, %v903_v14  ;;  %2409 = vpow2.f32 %v1709_v48  ;;  %v2404_v39 = vpop.eup %2403  ;;  %v1069_v48 = vrot.slane %v3368_v22, 4 }
 0x164   :  { %2411 = vpow2.f32 %v1711_v0  ;;  %v818_v11 = vpop.f32.mrb[14].mxu0  ;;  %v2406_v42 = vpop.eup %2405 }
 0x165   :  { %v907_v12 = vpop.f32.mrb[14].mxu1  ;;  %2413 = vpow2.f32 %v1710_v3  ;;  %v1717_v16 = vmul.f32 -1.442695, %v818_v11  ;;  %v820_v27 = vpop.f32.mrb[15].mxu0 }
 0x166   :  { %v1719_v18 = vmul.f32 -1.442695, %v907_v12  ;;  %v909_v28 = vpop.f32.mrb[15].mxu1  ;;  %2415 = vpow2.f32 %v1712_v7  ;;  %v1718_v29 = vmul.f32 -1.442695, %v820_v27  ;;  %v2408_v43 = vpop.eup %2407  ;;  %v1076_v7 = vrot.slane %v3374_v44, 4 }
 0x167   :  { %v1720_v30 = vmul.f32 -1.442695, %v909_v28  ;;  %2417 = vpow2.f32 %v1717_v16  ;;  %v3388_v27 = vld [vmem:[%s3574_s0] sm:$0xff]  ;;  %s2498_s0 = smov [#allocation5]  }
 0x168   :  { %2419 = vpow2.f32 %v1719_v18  ;;  %v1090_v18 = vrot.slane %v3376_v45, 4  ;;  %s1553_s14 = sshll.u32 %s2498_s0, 4  ;;  %s1554_s14 = int_to_ptr.vmem [resolvable:$true] %s1553_s14 }
 0x169   :  { %2421 = vpow2.f32 %v1718_v29  ;;  %s2471_s15 = scalar_lea.vmem %s1554_s14, 128  ;;  %p2476_p1 = scmp.lt.s32.totalorder %s1554_s14, %s1554_s14 }
 0x16a   :  { %2423 = vpow2.f32 %v1720_v30  ;;  %p2472_p0 = scmp.ne.s32.totalorder %s1554_s14, %s2471_s15  ;;  %p2477_p2 = scmp.lt.s32.totalorder %s2471_s15, %s2471_s15 }
 0x16b   :  { %2425 = vtanh.f32 %v891_v62 }
 0x16c   :  { %2427 = vtanh.f32 %v806_v24  ;;  %p2478_p3 = por %p2477_p2, %p2476_p1 }
 0x16d   :  { %v2410_v46 = vpop.eup %2409  ;;  %2429 = vtanh.f32 %v895_v31 }
 0x16e   :  { %v2412_v53 = vpop.eup %2411  ;;  %2431 = vtanh.f32 %v808_v51  ;;  %v980_v54 = vadd.f32 1.0, %v2410_v46  ;;  %p2479_p4 = pnand %p2478_p3, %p2472_p0 }
 0x16f   :  { %v2414_v55 = vpop.eup %2413  ;;  %2433 = vtanh.f32 %v897_v63  ;;  %v982_v56 = vadd.f32 1.0, %v2412_v53  ;;  %v3378_v63 = vshrl.u32 %v1124_v59, 7 }
 0x170   :  { %v2416_v1 = vpop.eup %2415  ;;  %2435 = vrcp.f32 %v980_v54  ;;  %v981_v2 = vadd.f32 1.0, %v2414_v55  ;;  %v1084_v55 = vadd.f32 %v1083_v8, %v3372_v41 }
 0x171   :  { %v2418_v5 = vpop.eup %2417  ;;  %2437 = vrcp.f32 %v982_v56  ;;  %v983_v6 = vadd.f32 1.0, %v2416_v1  ;;  %v1132_v11 = vsub.s32 0, %v3378_v63  ;;  %v1136_v28 = vsub.s32 1, %v3378_v63 }
 0x172   :  { %v2420_v20 = vpop.eup %2419  ;;  %2439 = vrcp.f32 %v981_v2  ;;  %v988_v21 = vadd.f32 1.0, %v2418_v5  ;;  %v1140_v29 = vsub.s32 2, %v3378_v63  ;;  %v1077_v1 = vadd.f32 %v1076_v7, %v3374_v44 }
 0x173   :  { %v2422_v23 = vpop.eup %2421  ;;  %2441 = vrcp.f32 %v983_v6  ;;  %v990_v38 = vadd.f32 1.0, %v2420_v20  ;;  %v3396_v2 = vrot.slane %v3388_v27, %v1132_v11  ;;  %v1144_v5 = vsub.s32 3, %v3378_v63 }
 0x174   :  { %v2424_v60 = vpop.eup %2423  ;;  %2443 = vrcp.f32 %v988_v21  ;;  %v989_v61 = vadd.f32 1.0, %v2422_v23  ;;  %v1091_v21 = vadd.f32 %v1090_v18, %v3376_v45 }
 0x175   :  { %v2426_v62 = vpop.eup %2425  ;;  %2445 = vrcp.f32 %v990_v38  ;;  %v991_v24 = vadd.f32 1.0, %v2424_v60  ;;  %v3415_v11 = vrot.slane %v3388_v27, %v1144_v5  ;;  %vm1162_vm2 = vcmp.eq.s32.totalorder %v3378_v63, %v3396_v2 }
 0x176   :  { %v2428_v31 = vpop.eup %2427  ;;  %2447 = vrcp.f32 %v989_v61  ;;  %v1092_v8 = vrot.slane %v1091_v21, 2 }
 0x177   :  { %v2430_v51 = vpop.eup %2429  ;;  %2449 = vrcp.f32 %v991_v24  ;;  %v1085_v24 = vrot.slane %v1084_v55, 2  ;;  %vm1165_vm5 = vcmp.eq.s32.totalorder %v3378_v63, %v3415_v11 }
 0x178   :  { %v2432_v37 = vpop.eup %2431 }
 0x179   :  { %v2434_v47 = vpop.eup %2433 }
 0x17a   :  { %v2436_v0 = vpop.eup %2435 }
 0x17b   :  { %v2438_v14 = vpop.eup %2437  ;;  %v1028_v3 = vmul.f32 %v2436_v0, %v2404_v39  ;;  %v1070_v39 = vadd.f32 %v1069_v48, %v3368_v22  ;;  %v3404_v22 = vrot.slane %v3388_v27, %v1140_v29 }
 0x17c   :  { %v2440_v12 = vpop.eup %2439  ;;  %v1030_v16 = vmul.f32 %v2438_v14, %v2406_v42 }
 0x17d   :  { %v2442_v30 = vpop.eup %2441  ;;  %v1029_v46 = vmul.f32 %v2440_v12, %v2408_v43  ;;  %v3401_v43 = vrot.slane %v3388_v27, %v1136_v28  ;;  %v1056_v38 = vmul.f32 %v3358_v4, %v1028_v3  ;;  %v1071_v59 = vrot.slane %v1070_v39, 2 }
 0x17e   :  { %v2444_v53 = vpop.eup %2443  ;;  %v1031_v54 = vmul.f32 %v2442_v30, %v2426_v62  ;;  %v1058_v61 = vmul.f32 %v3358_v4, %v1030_v16  ;;  %v1086_v12 = vadd.f32 %v1085_v24, %v1084_v55  ;;  %v1148_v28 = vsub.s32 4, %v3378_v63 }
 0x17f   :  { %v2446_v42 = vpop.eup %2445  ;;  %v1036_v56 = vmul.f32 %v2444_v53, %v2428_v31  ;;  %v1057_v45 = vmul.f32 %v3358_v4, %v1029_v46  ;;  %v1072_v3 = vadd.f32 %v1071_v59, %v1070_v39  ;;  %vm1164_vm3 = vcmp.eq.s32.totalorder %v3378_v63, %v3404_v22 }
 0x180   :  { %v2448_v6 = vpop.eup %2447  ;;  %v1038_v20 = vmul.f32 %v2446_v42, %v2430_v51  ;;  %v1078_v51 = vrot.slane %v1077_v1, 2  ;;  %v1059_v0 = vmul.f32 %v3358_v4, %v1031_v54  ;;  %v1093_v46 = vadd.f32 %v1092_v8, %v1091_v21 }
 0x181   :  { %v2450_v41 = vpop.eup %2449  ;;  %v1037_v23 = vmul.f32 %v2448_v6, %v2432_v37  ;;  %v1064_v44 = vmul.f32 %v3360_v40, %v1036_v56  ;;  %v1152_v54 = vsub.s32 5, %v3378_v63  ;;  %vm1163_vm4 = vcmp.eq.s32.totalorder %v3378_v63, %v3401_v43 }
 0x182   :  { %v1039_v60 = vmul.f32 %v2450_v41, %v2434_v47  ;;  %v1066_v62 = vmul.f32 %v3360_v40, %v1038_v20  ;;  %v1079_v29 = vadd.f32 %v1078_v51, %v1077_v1  ;;  %v1073_v55 = vrot.slane %v1072_v3, 1 }
 0x183   :  { %v1065_v31 = vmul.f32 %v3360_v40, %v1037_v23  ;;  %v1096_v48 = vadd.f32 %v1064_v44, %v1056_v38  ;;  %v1160_v1 = vsub.s32 7, %v3378_v63  ;;  %v1087_v5 = vrot.slane %v1086_v12, 1 }
 0x184   :  { %v1067_v37 = vmul.f32 %v3360_v40, %v1039_v60  ;;  %v1110_v14 = vadd.f32 %v1066_v62, %v1058_v61  ;;  %v1156_v40 = vsub.s32 6, %v3378_v63  ;;  %v3430_v21 = vrot.slane %v3388_v27, %v1148_v28 }
 0x185   :  { %v1097_v7 = vrot.slane %v1096_v48, 4  ;;  %v1103_v47 = vadd.f32 %v1065_v31, %v1057_v45  ;;  %v1080_v41 = vrot.slane %v1079_v29, 1  ;;  %v1094_v59 = vrot.slane %v1093_v46, 1 }
 0x186   :  { %v1111_v16 = vrot.slane %v1110_v14, 4  ;;  %v1117_v18 = vadd.f32 %v1067_v37, %v1059_v0  ;;  %v3433_v44 = vrot.slane %v3388_v27, %v1156_v40  ;;  %v3436_v62 = vrot.slane %v3388_v27, %v1152_v54 }
 0x187   :  { %v1098_v4 = vadd.f32 %v1097_v7, %v1096_v48  ;;  %v1104_v30 = vrot.slane %v1103_v47, 4  ;;  %v1074_v24 = vadd.f32 %v1073_v55, %v1072_v3  ;;  %v3439_v51 = vrot.slane %v3388_v27, %v1160_v1 }
 0x188   :  { %v1112_v39 = vadd.f32 %v1111_v16, %v1110_v14  ;;  %v1118_v53 = vrot.slane %v1117_v18, 4  ;;  %v1088_v48 = vadd.f32 %v1087_v5, %v1086_v12  ;;  %vm1166_vm6 = vcmp.eq.s32.totalorder %v3378_v63, %v3430_v21 }
 0x189   :  { %v1099_v42 = vrot.slane %v1098_v4, 2  ;;  %v1105_v56 = vadd.f32 %v1104_v30, %v1103_v47  ;;  %v1081_v8 = vadd.f32 %v1080_v41, %v1079_v29  ;;  %vm1168_vm7 = vcmp.eq.s32.totalorder %v3378_v63, %v3433_v44 }
 0x18a   :  { %v1113_v6 = vrot.slane %v1112_v39, 2  ;;  %v1119_v20 = vadd.f32 %v1118_v53, %v1117_v18  ;;  %v1095_v47 = vadd.f32 %v1094_v59, %v1093_v46  ;;  %vm1167_vm8 = vcmp.eq.s32.totalorder %v3378_v63, %v3436_v62  ;;  %v3607_v62 = vld [vmem:[#allocation9_spill] sm:$0xff] }
 0x18b   :  { %v1100_v23 = vadd.f32 %v1099_v42, %v1098_v4  ;;  %v1106_v38 = vrot.slane %v1105_v56, 2  ;;  %vm1169_vm9 = vcmp.eq.s32.totalorder %v3378_v63, %v3439_v51  ;;  %v1170_v12 = vsel %vm1162_vm2, %v1074_v24, -1e+30  ;;  %v3612_v51 = vld [vmem:[#allocation15_spill] sm:$0xff] }
 0x18c   :  { %v1114_v60 = vadd.f32 %v1113_v6, %v1112_v39  ;;  %v1120_v61 = vrot.slane %v1119_v20, 2  ;;  %v1172_v29 = vsel %vm1164_vm3, %v1088_v48, -1e+30  ;;  %v1171_v40 = vsel %vm1163_vm4, %v1081_v8, -1e+30 }
 0x18d   :  { %v1101_v45 = vrot.slane %v1100_v23, 1  ;;  %v1107_v31 = vadd.f32 %v1106_v38, %v1105_v56  ;;  %v1173_v53 = vsel %vm1165_vm5, %v1095_v47, -1e+30  ;;  %v2496_v6 = vmov -1e+30  }
 0x18e   :  { %v1115_v0 = vrot.slane %v1114_v60, 1  ;;  %v1121_v37 = vadd.f32 %v1120_v61, %v1119_v20  ;;  %23 = vst.msk [vmem:[#allocation2] sm:$0xff] %vm22_vm10, %v2496_v6  ;;  %v2497_v20 = vmov 0.0   ;;  %v3608_v6 = vld [vmem:[#allocation11_spill] sm:$0xff] }
 0x18f   :  { %v1102_v14 = vadd.f32 %v1101_v45, %v1100_v23  ;;  %v1108_v7 = vrot.slane %v1107_v31, 1  ;;  %26 = vst.msk [vmem:[#allocation4] sm:$0xff] %vm25_vm0, %v2497_v20 }
 0x190   :  { %v1116_v16 = vadd.f32 %v1115_v0, %v1114_v60  ;;  %v1122_v3 = vrot.slane %v1121_v37, 1  ;;  %24 = vst.msk [vmem:[#allocation3] sm:$0xff] %vm22_vm10, %v2497_v20  ;;  %v3610_v20 = vld [vmem:[#allocation14_spill] sm:$0xff] }
 0x191   :  { %v1109_v27 = vadd.f32 %v1108_v7, %v1107_v31  ;;  %v1174_v18 = vsel %vm1166_vm6, %v1102_v14, -1e+30 }
 0x192   :  { %v1123_v28 = vadd.f32 %v1122_v3, %v1121_v37  ;;  %v1176_v4 = vsel %vm1168_vm7, %v1116_v16, -1e+30  ;;  %v1179_v30 = vmax.f32 %v1170_v12, %v1174_v18 }
 0x193   :  { %v1175_v46 = vsel %vm1167_vm8, %v1109_v27, -1e+30  ;;  %v1181_v39 = vmax.f32 %v1172_v29, %v1176_v4 }
 0x194   :  { %v1177_v54 = vsel %vm1169_vm9, %v1123_v28, -1e+30  ;;  %v1180_v55 = vmax.f32 %v1171_v40, %v1175_v46 }
 0x195   :  { %v1182_v42 = vmax.f32 %v1173_v53, %v1177_v54  ;;  %v1178_v41 = vld [vmem:[#allocation2] sm:$0xff] }
 0x196   :  { %v1183_v56 = vmax.f32 %v1179_v30, %v1180_v55 }
 0x197   :  { %v1184_v1 = vmax.f32 %v1181_v39, %v1182_v42 }
 0x199   :  { %v1185_v5 = vmax.f32 %v1183_v56, %v1184_v1 }
 0x19b   :  { %1186 = vmax.xlane.f32.xlu1 %v1185_v5 }
 0x228   :  { %v1187_v23 = vpop.xlane.xlu1 %1186 }
 0x229   :  { %v1188_v38 = vmax.f32 %v1178_v41, %v1187_v23  ;;  %v3615_v23 = vld [vmem:[#allocation17_spill] sm:$0xff] }
 0x22b   :  { %v1189_v59 = vsub.f32 %v1178_v41, %v1188_v38  ;;  %1532 = vst.msk [vmem:[#allocation2] sm:$0xff] %vm22_vm10, %v1188_v38  ;;  %1194 = vperm.xlu1 %2354, %v1188_v38   ;;  %v3613_v41 = vld [vmem:[#allocation16_spill] sm:$0xff]  ;;  %v3616_v38 = vld [vmem:[#allocation19_spill] sm:$0xff] }
 0x22d   :  { %v1190_v60 = vmul.f32 1.442695, %v1189_v59  ;;  %v1229_v59 = vld [vmem:[#allocation3] sm:$0xff] }
 0x22f   :  { %2451 = vpow2.f32 %v1190_v60 }
 0x239   :  { %v3477_v61 = vpop.eup %2451 }
 0x23a   :  { %1246 = vperm.xlu1 %2354, %v3477_v61  }
 0x2aa   :  { %v1195_v45 = vpop.permute.xlu1 %1194 }
 0x2ab   :  { %v1197_v31 = vsub.f32 %v1074_v24, %v1195_v45  ;;  %v1198_v0 = vsub.f32 %v1081_v8, %v1195_v45  ;;  %v1199_v37 = vsub.f32 %v1088_v48, %v1195_v45  ;;  %v1200_v7 = vsub.f32 %v1095_v47, %v1195_v45 }
 0x2ac   :  { %v1202_v3 = vsub.f32 %v1109_v27, %v1195_v45  ;;  %v1204_v12 = vsub.f32 %v1123_v28, %v1195_v45  ;;  %v1201_v18 = vsub.f32 %v1102_v14, %v1195_v45  ;;  %v1203_v53 = vsub.f32 %v1116_v16, %v1195_v45 }
 0x2ad   :  { %v1205_v29 = vmul.f32 1.442695, %v1197_v31  ;;  %v1207_v4 = vmul.f32 1.442695, %v1198_v0  ;;  %v1209_v30 = vmul.f32 1.442695, %v1199_v37 }
 0x2ae   :  { %v1211_v40 = vmul.f32 1.442695, %v1200_v7  ;;  %v1215_v46 = vmul.f32 1.442695, %v1202_v3  ;;  %v1219_v39 = vmul.f32 1.442695, %v1204_v12 }
 0x2af   :  { %2453 = vpow2.f32 %v1205_v29  ;;  %v1213_v54 = vmul.f32 1.442695, %v1201_v18  ;;  %v1217_v24 = vmul.f32 1.442695, %v1203_v53  ;;  %v1243_v12 = vld [vmem:[#allocation4] sm:$0xff] }
 0x2b0   :  { %2455 = vpow2.f32 %v1207_v4 }
 0x2b1   :  { %2457 = vpow2.f32 %v1209_v30 }
 0x2b2   :  { %2459 = vpow2.f32 %v1211_v40 }
 0x2b3   :  { %2461 = vpow2.f32 %v1215_v46 }
 0x2b4   :  { %2463 = vpow2.f32 %v1219_v39 }
 0x2b5   :  { %2465 = vpow2.f32 %v1213_v54 }
 0x2b6   :  { %2467 = vpow2.f32 %v1217_v24 }
 0x2b9   :  { %v2454_v48 = vpop.eup %2453 }
 0x2ba   :  { %v2456_v8 = vpop.eup %2455  ;;  %v1221_v14 = vsel %vm1162_vm2, %v2454_v48, 0.0 }
 0x2bb   :  { %v2458_v47 = vpop.eup %2457  ;;  %1721 = vmatprep.mubr.msk.f32.mxu0 %vm1163_vm4, %v2456_v8  ;;  %v1222_v16 = vsel %vm1163_vm4, %v2456_v8, 0.0 }
 0x2bc   :  { %v2460_v27 = vpop.eup %2459  ;;  %1722 = vmatmul.mubr.msk.f32.vlgmr.msra.gmra.mrb[16].mxu0 %vm1162_vm2, %v2454_v48  ;;  %v1231_v28 = vadd.f32 %v1222_v16, %v1221_v14  ;;  %v1223_v42 = vsel %vm1164_vm3, %v2458_v47, 0.0 }
 0x2bd   :  { %v2462_v55 = vpop.eup %2461  ;;  %1723 = vmatprep.mubr.msk.f32.mxu1 %vm1165_vm5, %v2460_v27  ;;  %2288 = vmatpush3.bf16.msra.mxu0 %v2943_v17  ;;  %v1224_v17 = vsel %vm1165_vm5, %v2460_v27, 0.0 }
 0x2be   :  { %v2464_v56 = vpop.eup %2463  ;;  %1724 = vmatmul.mubr.msk.f32.vlgmr.msra.gmra.mrb[16].mxu1 %vm1164_vm3, %v2458_v47  ;;  %1725 = vmatprep.mubr.msk.f32.mxu0 %vm1167_vm8, %v2462_v55  ;;  %v1232_v2 = vadd.f32 %v1231_v28, %v1223_v42  ;;  %v1226_v11 = vsel %vm1167_vm8, %v2462_v55, 0.0 }
 0x2bf   :  { %v2466_v43 = vpop.eup %2465  ;;  %2320 = vmatpush3.bf16.msra.mxu1 %v2945_v19  ;;  %1727 = vmatprep.mubr.msk.f32.mxu1 %vm1169_vm9, %v2464_v56 }
 0x2c0   :  { %2290 = vmatprep.subr.bf16.mxu0 %v2952_v25  ;;  %2322 = vmatprep.subr.bf16.mxu1 %v2954_v26  ;;  %v1233_v22 = vadd.f32 %v1232_v2, %v1224_v17  ;;  %v1225_v1 = vsel %vm1166_vm6, %v2466_v43, 0.0  ;;  %v2468_v19 = vpop.eup %2467 }
 0x2c1   :  { %2292 = vmatpush3.bf16.msra.mxu0 %v3013_v49  ;;  %v1227_v26 = vsel %vm1168_vm7, %v2468_v19, 0.0 }
 0x2c2   :  { %2294 = vmatprep.subr.bf16.mxu0 %v3022_v52  ;;  %v1234_v5 = vadd.f32 %v1233_v22, %v1225_v1 }
 0x2c3   :  { %2324 = vmatpush3.bf16.msra.mxu1 %v3015_v50  ;;  %v1228_v50 = vsel %vm1169_vm9, %v2464_v56, 0.0 }
 0x2c4   :  { %2326 = vmatprep.subr.bf16.mxu1 %v3024_v57  ;;  %v1235_v25 = vadd.f32 %v1234_v5, %v1226_v11  ;;  %v3605_v57 = vld [vmem:[#allocation8_spill] sm:$0xff] }
 0x2c5   :  { %2296 = vmatpush3.bf16.msra.mxu0 %v3074_v15  ;;  %v3606_v15 = vld [vmem:[#allocation10_spill] sm:$0xff] }
 0x2c6   :  { %2298 = vmatprep.subr.bf16.mxu0 %v3082_v33  ;;  %v1236_v49 = vadd.f32 %v1235_v25, %v1227_v26  ;;  %v3609_v33 = vld [vmem:[#allocation12_spill] sm:$0xff] }
 0x2c7   :  { %2328 = vmatpush3.bf16.msra.mxu1 %v3076_v32  ;;  %v3611_v32 = vld [vmem:[#allocation13_spill] sm:$0xff] }
 0x2c8   :  { %2330 = vmatprep.subr.bf16.mxu1 %v3084_v34  ;;  %v1237_v52 = vadd.f32 %v1236_v49, %v1228_v50  ;;  %v3614_v34 = vld [vmem:[#allocation18_spill] sm:$0xff] }
 0x2c9   :  { %2300 = vmatpush3.bf16.msra.mxu0 %v3605_v57 }
 0x2ca   :  { %1238 = vadd.xlane.f32.xlu0 %v1237_v52  ;;  %2302 = vmatprep.subr.bf16.mxu0 %v3606_v15 }
 0x2cb   :  { %2332 = vmatpush3.bf16.msra.mxu1 %v3607_v62 }
 0x2cc   :  { %2334 = vmatprep.subr.bf16.mxu1 %v3608_v6 }
 0x2cd   :  { %2304 = vmatpush3.bf16.msra.mxu0 %v3609_v33 }
 0x2ce   :  { %2306 = vmatprep.subr.bf16.mxu0 %v3610_v20 }
 0x2cf   :  { %2336 = vmatpush3.bf16.msra.mxu1 %v3611_v32 }
 0x2d0   :  { %2338 = vmatprep.subr.bf16.mxu1 %v3612_v51 }
 0x2d1   :  { %2308 = vmatpush3.bf16.msra.mxu0 %v3613_v41 }
 0x2d2   :  { %2310 = vmatprep.subr.bf16.mxu0 %v3614_v34 }
 0x2d3   :  { %2340 = vmatpush3.bf16.msra.mxu1 %v3615_v23 }
 0x2d4   :  { %2342 = vmatprep.subr.bf16.mxu1 %v3616_v38 }
 0x2d5   :  { %2312 = vmatpush3.bf16.msra.mxu0 %v3254_v58  ;;  %v1230_v58 = vmul.f32 %v3477_v61, %v1229_v59  ;;  %v1247_v61 = vpop.permute.xlu1 %1246 }
 0x2d6   :  { %2314 = vmatprep.subr.bf16.mxu0 %v3258_v10  ;;  %v1249_v30 = vmul.f32 %v1247_v61, %v1243_v12 }
 0x2d7   :  { %2344 = vmatpush3.bf16.msra.mxu1 %v3256_v9 }
 0x2d8   :  { %2346 = vmatprep.subr.bf16.mxu1 %v3260_v13 }
 0x2d9   :  { %2316 = vmatpush3.bf16.msra.mxu0 %v3286_v35 }
 0x2db   :  { %2348 = vmatpush3.bf16.msra.mxu1 %v3288_v36 }
 0x2dc   :  { %1726 = vmatmul.mubr.msk.f32.vlgmr.msra.gmra.mrb[18].mxu0 %vm1166_vm6, %v2466_v43 }
 0x2de   :  { %1728 = vmatmul.mubr.msk.f32.vlgmr.msra.gmra.mrb[18].mxu1 %vm1168_vm7, %v2468_v19 }
 0x357   :  { %v1239_v10 = vpop.xlane.xlu0 %1238 }
 0x358   :  { %v1240_v60 = vadd.f32 %v1239_v10, %v1230_v58 }
 0x35a   :  { %1242 = vst.msk [vmem:[#allocation3] sm:$0xff] %vm22_vm10, %v1240_v60 }
 0x361   :  { %v1537_v9 = vld [vmem:[#allocation3] sm:$0xff] }
 0x362   :  { %v1538_v13 = vadd.f32 1e-16, %v1537_v9 }
 0x364   :  { %1541 = vperm.xlu1 %2354, %v1538_v13  }
 0x38f   :  { %v1921_v35 = vpop.f32.mrb[16].mxu0 }
 0x390   :  { %v1922_v36 = vpop.f32.mrb[17].mxu0 }
 0x391   :  { %v1956_v45 = vpop.f32.mrb[16].mxu1  ;;  %v1923_v31 = vadd.f32 %v1922_v36, %v1921_v35 }
 0x392   :  { %v1957_v21 = vpop.f32.mrb[17].mxu1 }
 0x393   :  { %v1958_v0 = vadd.f32 %v1957_v21, %v1956_v45 }
 0x395   :  { %v1387_v37 = vadd.f32 %v1958_v0, %v1923_v31 }
 0x3af   :  { %v1991_v7 = vpop.f32.mrb[18].mxu0 }
 0x3b0   :  { %v1992_v63 = vpop.f32.mrb[19].mxu0 }
 0x3b1   :  { %v2026_v44 = vpop.f32.mrb[18].mxu1  ;;  %v1993_v3 = vadd.f32 %v1992_v63, %v1991_v7 }
 0x3b2   :  { %v2027_v18 = vpop.f32.mrb[19].mxu1 }
 0x3b3   :  { %v1457_v29 = vadd.f32 %v1993_v3, %v1387_v37  ;;  %v2028_v4 = vadd.f32 %v2027_v18, %v2026_v44 }
 0x3b5   :  { %v1527_v40 = vadd.f32 %v2028_v4, %v1457_v29 }
 0x3b7   :  { %v1530_v46 = vadd.f32 %v1527_v40, %v1249_v30 }
 0x3b9   :  { %1531 = vst.msk [vmem:[#allocation4] sm:$0xff] %vm25_vm0, %v1530_v46 }
 0x3c0   :  { %v1536_v54 = vld [vmem:[#allocation4] sm:$0xff] }
 0x3e3   :  { %v1542_v39 = vpop.permute.xlu1 %1541 }
 0x3e4   :  { %2469 = vrcp.f32 %v1542_v39 }
 0x3ee   :  { %v2470_v53 = vpop.eup %2469 }
 0x3ef   :  { %v1545_v24 = vmul.f32 %v2470_v53, %v1536_v54 }
 0x3f1   :  { %1546 = vst.msk [vmem:[#allocation5] sm:$0xff] %vm25_vm0, %v1545_v24 }
 0x3f2   :  { %2482 = shalt.err (!%p2479_p4)
}
 0x3f3   :  { %s2483_s18 = scalar_lea.hbm %s3578_s4, 128 }
 0x3f4   :  { %p2484_p5 = scmp.ne.s32.totalorder %s3578_s4, %s2483_s18  ;;  %p2487_p6 = scmp.lt.u32.totalorder %s2483_s18, %s3578_s4 }
 0x3f6   :  { %p2489_p7 = pnand %p2487_p6, %p2484_p5 }
 0x3f8   :  { %2492 = shalt.err (!%p2489_p7)
}
 0x3f9   :  { %1556 = dma.vmem_to_hbm [thread:$0]  %s1554_s14, 128, %s3578_s4, [#allocation6]  }
 0x3fa   :  { %2493 = dma.done.wait [#allocation6], 128  }
 0x3fb   :  { %2494 = vsyncadd [#allocation6], 4294967168 }
 0x3fc   :  { %1560 = vsyncpa [#allocation6], 1 }

</bundles_post_ra>
